<compile_context>
chip_gen: v6e
topology: v6e:2x2x1
jax: 0.10.0
libtpu: 0.0.40
codegen_flags: <defaults>
</compile_context>

<pallas_src>
import functools
import math

import jax
import jax.numpy as jnp
import numpy as np
from jax.experimental import pallas as pl
from jax.experimental.pallas import tpu as pltpu


def _transformer_kernel(x_ref, sc_out_ref,
                        wqkv_ref, wc_ref, w13_ref, w2_ref,
                        o_ref,
                        x_vmem,
                        *, n_head, batch, seq, eps):
    """One layer per grid step; activations resident in x_vmem across the grid.

    x_ref    : [M, D]      input activations (M = B*S), loaded once (constant map)
    sc_out_ref: [1, D]     final RMSNorm scale (resident)
    wqkv_ref : [1, D, 3D]  fused (norm-scaled) Q|K|V weights for this layer
    wc_ref   : [1, D, D]   c_proj weights
    w13_ref  : [1, D, 2F]  fused (norm-scaled) W1|W3 weights
    w2_ref   : [1, F, D]   W2 weights
    o_ref    : [M, D]      output (written on the last layer only)
    x_vmem   : [M, D] f32  activation accumulator (persists across grid steps)
    """
    layer = pl.program_id(0)
    last = pl.num_programs(0) - 1

    @pl.when(layer == 0)
    def _():
        x_vmem[...] = x_ref[...]

    x = x_vmem[...]                                   # [M, D] f32
    M, D = x.shape
    dh = D // n_head
    scale = 1.0 / math.sqrt(dh)

    # ---------- attention ----------
    r = jax.lax.rsqrt(jnp.mean(x * x, axis=-1, keepdims=True) + eps)
    xn = (x * r).astype(jnp.bfloat16)                 # norm scales folded into wqkv
    qkv = jnp.dot(xn, wqkv_ref[0],
                  preferred_element_type=jnp.float32)  # [M, 3D] f32
    q = qkv[:, 0 * D:1 * D]
    k = qkv[:, 1 * D:2 * D]
    v = qkv[:, 2 * D:3 * D]

    per_batch = []
    for b in range(batch):
        rows = slice(b * seq, (b + 1) * seq)
        heads = []
        for h in range(n_head):
            cols = slice(h * dh, (h + 1) * dh)
            qh = q[rows, cols].astype(jnp.bfloat16)
            kh = k[rows, cols].astype(jnp.bfloat16)
            vh = v[rows, cols].astype(jnp.bfloat16)
            # scores = qh @ kh^T (contraction on last dims, no explicit transpose)
            s = jax.lax.dot_general(qh, kh, (((1,), (1,)), ((), ())),
                                    preferred_element_type=jnp.float32)
            s = s * scale
            s = s - jnp.max(s, axis=-1, keepdims=True)
            e = jnp.exp(s)
            p = e * pl.reciprocal(jnp.sum(e, axis=-1, keepdims=True))
            heads.append(jnp.dot(p.astype(jnp.bfloat16), vh,
                                 preferred_element_type=jnp.float32))
        per_batch.append(jnp.concatenate(heads, axis=-1))    # [S, D]
    attn = jnp.concatenate(per_batch, axis=0)                 # [M, D]

    x = x + jnp.dot(attn.astype(jnp.bfloat16), wc_ref[0],
                    preferred_element_type=jnp.float32)       # residual 1

    # ---------- SwiGLU FFN ----------
    r2 = jax.lax.rsqrt(jnp.mean(x * x, axis=-1, keepdims=True) + eps)
    hn = (x * r2).astype(jnp.bfloat16)                # norm_ff scale folded into w13
    ab = jnp.dot(hn, w13_ref[0],
                 preferred_element_type=jnp.float32)  # [M, 2F]
    F = ab.shape[-1] // 2
    a = ab[:, :F]
    g = (a * jax.nn.sigmoid(a)) * ab[:, F:]           # silu(a) * b
    x = x + jnp.dot(g.astype(jnp.bfloat16), w2_ref[0],
                    preferred_element_type=jnp.float32)       # residual 2

    x_vmem[...] = x

    @pl.when(layer == last)
    def _():
        # fused Transformer.rms_out
        rf = jax.lax.rsqrt(jnp.mean(x * x, axis=-1, keepdims=True) + eps)
        o_ref[...] = (x * rf * sc_out_ref[...]).astype(o_ref.dtype)


@functools.partial(jax.jit, static_argnames=("n_head",))
def transformer_forward(x, wqkv, wc, w13, w2, sc_out, *, n_head):
    """Transformer.forward(x) with rope=None, attn_mask=None, kv_cache=None."""
    B, S, D = x.shape
    L = wqkv.shape[0]
    threeD = wqkv.shape[-1]
    twoF = w13.shape[-1]
    F = w2.shape[1]
    M = B * S
    x2 = x.reshape(M, D).astype(jnp.float32)

    kernel = functools.partial(_transformer_kernel,
                               n_head=n_head, batch=B, seq=S, eps=1e-6)

    out = pl.pallas_call(
        kernel,
        out_shape=jax.ShapeDtypeStruct((M, D), jnp.float32),
        grid=(L,),
        in_specs=[
            pl.BlockSpec((M, D), lambda l: (0, 0)),            # x (loaded once)
            pl.BlockSpec((1, D), lambda l: (0, 0)),            # sc_out (resident)
            pl.BlockSpec((1, D, threeD), lambda l: (l, 0, 0)),  # fused QKV (per layer)
            pl.BlockSpec((1, D, D), lambda l: (l, 0, 0)),       # c_proj
            pl.BlockSpec((1, D, twoF), lambda l: (l, 0, 0)),    # fused W1|W3
            pl.BlockSpec((1, F, D), lambda l: (l, 0, 0)),       # W2
        ],
        out_specs=pl.BlockSpec((M, D), lambda l: (0, 0)),       # resident, written once
        scratch_shapes=[pltpu.VMEM((M, D), jnp.float32)],
        compiler_params=pltpu.CompilerParams(
            dimension_semantics=("arbitrary",)),
    )(x2, sc_out, wqkv, wc, w13, w2)
    return out.reshape(B, S, D)


def _prepare_params(params, weight_dtype=jnp.bfloat16):
    """Fold RMSNorm scales into weight rows, fuse QKV / W1|W3, stack layers."""
    blocks = params["blocks"]
    wqkv = jnp.stack([
        jnp.concatenate([b["sc_q"].T * b["wq_t"],
                         b["sc_ctx"].T * b["wk_t"],
                         b["sc_ctx"].T * b["wv_t"]], axis=1)
        for b in blocks]).astype(weight_dtype)                    # [L, D, 3D]
    wc = jnp.stack([b["wc_t"] for b in blocks]).astype(weight_dtype)   # [L, D, D]
    w13 = jnp.stack([
        jnp.concatenate([b["sc_ff"].T * b["w1_t"],
                         b["sc_ff"].T * b["w3_t"]], axis=1)
        for b in blocks]).astype(weight_dtype)                    # [L, D, 2F]
    w2 = jnp.stack([b["w2_t"] for b in blocks]).astype(weight_dtype)   # [L, F, D]
    sc_out = params["sc_out"].astype(jnp.float32)                 # [1, D]
    return wqkv, wc, w13, w2, sc_out


def _reference_forward(x, params, n_head, n_layer):
    """Pure-JAX reference matching the PyTorch module semantics (f32)."""
    def rms(t, scale, eps=1e-6):
        ms = jnp.mean(t * t, axis=-1, keepdims=True)
        return t * jax.lax.rsqrt(ms + eps) * scale

    x = x.astype(jnp.float32)
    B, S, D = x.shape
    dh = D // n_head
    with jax.default_matmul_precision("highest"):
        for i in range(n_layer):
            p = params["blocks"][i]
            nq = rms(x, p["sc_q"])
            nc = rms(x, p["sc_ctx"])
            q = nq @ p["wq_t"]
            k = nc @ p["wk_t"]
            v = nc @ p["wv_t"]
            q = q.reshape(B, S, n_head, dh).transpose(0, 2, 1, 3)
            k = k.reshape(B, S, n_head, dh).transpose(0, 2, 1, 3)
            v = v.reshape(B, S, n_head, dh).transpose(0, 2, 1, 3)
            s = jnp.einsum("bhqd,bhkd->bhqk", q, k) / math.sqrt(dh)
            a = jax.nn.softmax(s, axis=-1)
            attn = jnp.einsum("bhqk,bhkd->bhqd", a, v)
            attn = attn.transpose(0, 2, 1, 3).reshape(B, S, D)
            x = x + attn @ p["wc_t"]
            h = rms(x, p["sc_ff"])
            u = h @ p["w1_t"]
            x = x + ((u * jax.nn.sigmoid(u)) * (h @ p["w3_t"])) @ p["w2_t"]
        x = rms(x, params["sc_out"])
    return x


if __name__ == "__main__":
    # Small but lane-dense shapes consistent with the module:
    # batch=2, seq=16, d_model=128, n_head=4, n_layer=2, dim_feedforward=256.
    B, S, D, H, L, FF = 2, 16, 128, 4, 2, 256

    root = jax.random.PRNGKey(0)
    kx, kout, *kblocks = jax.random.split(root, 2 + L)

    def make_block(key):
        ks = jax.random.split(key, 10)
        lin = lambda k, shape: jax.random.normal(k, shape, jnp.float32) * 0.05
        return dict(
            sc_q=1.0 + 0.1 * jax.random.normal(ks[0], (1, D), jnp.float32),
            sc_ctx=1.0 + 0.1 * jax.random.normal(ks[1], (1, D), jnp.float32),
            sc_ff=1.0 + 0.1 * jax.random.normal(ks[2], (1, D), jnp.float32),
            wq_t=lin(ks[3], (D, D)),    # = nn.Linear(D, D).weight.T
            wk_t=lin(ks[4], (D, D)),
            wv_t=lin(ks[5], (D, D)),
            wc_t=lin(ks[6], (D, D)),
            w1_t=lin(ks[7], (D, FF)),   # = w1.weight.T
            w3_t=lin(ks[8], (D, FF)),   # = w3.weight.T
            w2_t=lin(ks[9], (FF, D)),   # = w2.weight.T
        )

    params = dict(
        blocks=[make_block(k) for k in kblocks],
        sc_out=1.0 + 0.1 * jax.random.normal(kout, (1, D), jnp.float32),
    )
    x = jax.random.normal(kx, (B, S, D), dtype=jnp.float32)

    wqkv, wc, w13, w2, sc_out = _prepare_params(params)

    out = transformer_forward(x, wqkv, wc, w13, w2, sc_out, n_head=H)
    jax.block_until_ready(out)

    # TODO(synk): positions/RoPE, attn_mask, kv_cache append/return and dropout
    # are not implemented (all None / 0 / False in the default eval-mode forward).

    ref = _reference_forward(x, params, H, L)
    # bf16 MXU operands vs. f32 "highest"-precision reference -> loosened tolerance.
    np.testing.assert_allclose(np.asarray(out), np.asarray(ref),
                               rtol=3e-2, atol=3e-2)

    print("KERNEL_OK")
</pallas_src>

<mosaic_0001>
module attributes {stable_mosaic.version = 11 : i64} {
  func.func @_transformer_kernel(%arg0: i32, %arg1: memref<32x128xf32, #tpu.memory_space<vmem>>, %arg2: memref<1x128xf32, #tpu.memory_space<vmem>>, %arg3: memref<1x128x384xbf16, #tpu.memory_space<vmem>>, %arg4: memref<1x128x128xbf16, #tpu.memory_space<vmem>>, %arg5: memref<1x128x512xbf16, #tpu.memory_space<vmem>>, %arg6: memref<1x256x128xbf16, #tpu.memory_space<vmem>>, %arg7: memref<32x128xf32, #tpu.memory_space<vmem>>, %arg8: memref<32x128xf32, #tpu.memory_space<vmem>>) attributes {dimension_semantics = [#tpu.dimension_semantics<arbitrary>], iteration_bounds = array<i64: 2>, scalar_prefetch = 0 : i64, scratch_operands = 1 : i64, tpu.core_type = #tpu.core_type<tc>, window_params = [{pipeline_mode = #tpu.pipeline_mode<synchronous>, transform_indices = @transform_0, window_bounds = array<i64: 32, 128>}, {pipeline_mode = #tpu.pipeline_mode<synchronous>, transform_indices = @transform_1, window_bounds = array<i64: 1, 128>}, {transform_indices = @transform_2, window_bounds = array<i64: 1, 128, 384>}, {transform_indices = @transform_3, window_bounds = array<i64: 1, 128, 128>}, {transform_indices = @transform_4, window_bounds = array<i64: 1, 128, 512>}, {transform_indices = @transform_5, window_bounds = array<i64: 1, 256, 128>}, {pipeline_mode = #tpu.pipeline_mode<synchronous>, transform_indices = @transform_6, window_bounds = array<i64: 32, 128>}]} {
    %c0_i32 = arith.constant 0 : i32
    %0 = arith.cmpi eq, %arg0, %c0_i32 : i32
    %1 = arith.extui %0 : i1 to i32
    %c0_i32_0 = arith.constant 0 : i32
    %2 = arith.cmpi ne, %1, %c0_i32_0 : i32
    scf.if %2 {
      %c0_67 = arith.constant 0 : index
      %c0_68 = arith.constant 0 : index
      %229 = vector.load %arg1[%c0_67, %c0_68] : memref<32x128xf32, #tpu.memory_space<vmem>>, vector<32x128xf32>
      %c0_69 = arith.constant 0 : index
      %c0_70 = arith.constant 0 : index
      %230 = vector.load %arg8[%c0_69, %c0_70] : memref<32x128xf32, #tpu.memory_space<vmem>>, vector<32x128xf32>
      tpu.vector_store %arg8[%c0_69, %c0_70], %229 {strides = array<i32>} : memref<32x128xf32, #tpu.memory_space<vmem>>, vector<32x128xf32>,
    } else {
    }
    %c0 = arith.constant 0 : index
    %c0_1 = arith.constant 0 : index
    %3 = vector.load %arg8[%c0, %c0_1] : memref<32x128xf32, #tpu.memory_space<vmem>>, vector<32x128xf32>
    %4 = arith.mulf %3, %3 : vector<32x128xf32>
    %cst = arith.constant dense<0.000000e+00> : vector<32xf32>
    %5 = vector.multi_reduction <add>, %4, %cst [1] : vector<32x128xf32> to vector<32xf32>
    %6 = vector.shape_cast %5 : vector<32xf32> to vector<32x1xf32>
    %cst_2 = arith.constant 1.280000e+02 : f32
    %7 = vector.broadcast %cst_2 : f32 to vector<32x1xf32>
    %8 = arith.divf %6, %7 : vector<32x1xf32>
    %cst_3 = arith.constant 9.99999997E-7 : f32
    %9 = vector.broadcast %cst_3 : f32 to vector<32x1xf32>
    %10 = arith.addf %8, %9 : vector<32x1xf32>
    %11 = math.rsqrt %10 : vector<32x1xf32>
    %12 = vector.broadcast %11 : vector<32x1xf32> to vector<32x128xf32>
    %13 = arith.mulf %3, %12 : vector<32x128xf32>
    %14 = arith.truncf %13 : vector<32x128xf32> to vector<32x128xbf16>
    %c0_4 = arith.constant 0 : index
    %c0_5 = arith.constant 0 : index
    %c0_6 = arith.constant 0 : index
    %15 = vector.load %arg3[%c0_4, %c0_5, %c0_6] : memref<1x128x384xbf16, #tpu.memory_space<vmem>>, vector<1x128x384xbf16>
    %16 = vector.shape_cast %15 : vector<1x128x384xbf16> to vector<128x384xbf16>
    %cst_7 = arith.constant dense<0.000000e+00> : vector<32x384xf32>
    %17 = tpu.matmul %14, %16, %cst_7 {dimension_numbers = #tpu.dot_dimension_numbers<[1], [0], [0], [1], [0, 0, 1, 1], [], []>} : vector<32x128xbf16>, vector<128x384xbf16>, vector<32x384xf32> -> vector<32x384xf32>
    %18 = vector.extract_strided_slice %17 {offsets = [0, 0], sizes = [32, 128], strides = [1, 1]} : vector<32x384xf32> to vector<32x128xf32>
    %19 = vector.extract_strided_slice %17 {offsets = [0, 128], sizes = [32, 128], strides = [1, 1]} : vector<32x384xf32> to vector<32x128xf32>
    %20 = vector.extract_strided_slice %17 {offsets = [0, 256], sizes = [32, 128], strides = [1, 1]} : vector<32x384xf32> to vector<32x128xf32>
    %21 = vector.extract_strided_slice %18 {offsets = [0, 0], sizes = [16, 32], strides = [1, 1]} : vector<32x128xf32> to vector<16x32xf32>
    %22 = arith.truncf %21 : vector<16x32xf32> to vector<16x32xbf16>
    %23 = vector.extract_strided_slice %19 {offsets = [0, 0], sizes = [16, 32], strides = [1, 1]} : vector<32x128xf32> to vector<16x32xf32>
    %24 = arith.truncf %23 : vector<16x32xf32> to vector<16x32xbf16>
    %25 = vector.extract_strided_slice %20 {offsets = [0, 0], sizes = [16, 32], strides = [1, 1]} : vector<32x128xf32> to vector<16x32xf32>
    %26 = arith.truncf %25 : vector<16x32xf32> to vector<16x32xbf16>
    %cst_8 = arith.constant dense<0.000000e+00> : vector<16x16xf32>
    %27 = tpu.matmul %22, %24, %cst_8 {dimension_numbers = #tpu.dot_dimension_numbers<[1], [1], [0], [0], [0, 0, 1, 0], [], []>} : vector<16x32xbf16>, vector<16x32xbf16>, vector<16x16xf32> -> vector<16x16xf32>
    %cst_9 = arith.constant 0.176776692 : f32
    %28 = vector.broadcast %cst_9 : f32 to vector<16x16xf32>
    %29 = arith.mulf %27, %28 : vector<16x16xf32>
    %cst_10 = arith.constant dense<0xFF800000> : vector<16xf32>
    %30 = vector.multi_reduction <maximumf>, %29, %cst_10 [1] : vector<16x16xf32> to vector<16xf32>
    %31 = vector.shape_cast %30 : vector<16xf32> to vector<16x1xf32>
    %32 = vector.broadcast %31 : vector<16x1xf32> to vector<16x16xf32>
    %33 = arith.subf %29, %32 : vector<16x16xf32>
    %34 = math.exp %33 : vector<16x16xf32>
    %cst_11 = arith.constant dense<0.000000e+00> : vector<16xf32>
    %35 = vector.multi_reduction <add>, %34, %cst_11 [1] : vector<16x16xf32> to vector<16xf32>
    %36 = vector.shape_cast %35 : vector<16xf32> to vector<16x1xf32>
    %37 = tpu.reciprocal %36 : vector<16x1xf32> -> vector<16x1xf32>
    %38 = vector.broadcast %37 : vector<16x1xf32> to vector<16x16xf32>
    %39 = arith.mulf %34, %38 : vector<16x16xf32>
    %40 = arith.truncf %39 : vector<16x16xf32> to vector<16x16xbf16>
    %cst_12 = arith.constant dense<0.000000e+00> : vector<16x32xf32>
    %41 = tpu.matmul %40, %26, %cst_12 {dimension_numbers = #tpu.dot_dimension_numbers<[1], [0], [0], [1], [0, 0, 1, 1], [], []>} : vector<16x16xbf16>, vector<16x32xbf16>, vector<16x32xf32> -> vector<16x32xf32>
    %42 = vector.extract_strided_slice %18 {offsets = [0, 32], sizes = [16, 32], strides = [1, 1]} : vector<32x128xf32> to vector<16x32xf32>
    %43 = arith.truncf %42 : vector<16x32xf32> to vector<16x32xbf16>
    %44 = vector.extract_strided_slice %19 {offsets = [0, 32], sizes = [16, 32], strides = [1, 1]} : vector<32x128xf32> to vector<16x32xf32>
    %45 = arith.truncf %44 : vector<16x32xf32> to vector<16x32xbf16>
    %46 = vector.extract_strided_slice %20 {offsets = [0, 32], sizes = [16, 32], strides = [1, 1]} : vector<32x128xf32> to vector<16x32xf32>
    %47 = arith.truncf %46 : vector<16x32xf32> to vector<16x32xbf16>
    %cst_13 = arith.constant dense<0.000000e+00> : vector<16x16xf32>
    %48 = tpu.matmul %43, %45, %cst_13 {dimension_numbers = #tpu.dot_dimension_numbers<[1], [1], [0], [0], [0, 0, 1, 0], [], []>} : vector<16x32xbf16>, vector<16x32xbf16>, vector<16x16xf32> -> vector<16x16xf32>
    %cst_14 = arith.constant 0.176776692 : f32
    %49 = vector.broadcast %cst_14 : f32 to vector<16x16xf32>
    %50 = arith.mulf %48, %49 : vector<16x16xf32>
    %cst_15 = arith.constant dense<0xFF800000> : vector<16xf32>
    %51 = vector.multi_reduction <maximumf>, %50, %cst_15 [1] : vector<16x16xf32> to vector<16xf32>
    %52 = vector.shape_cast %51 : vector<16xf32> to vector<16x1xf32>
    %53 = vector.broadcast %52 : vector<16x1xf32> to vector<16x16xf32>
    %54 = arith.subf %50, %53 : vector<16x16xf32>
    %55 = math.exp %54 : vector<16x16xf32>
    %cst_16 = arith.constant dense<0.000000e+00> : vector<16xf32>
    %56 = vector.multi_reduction <add>, %55, %cst_16 [1] : vector<16x16xf32> to vector<16xf32>
    %57 = vector.shape_cast %56 : vector<16xf32> to vector<16x1xf32>
    %58 = tpu.reciprocal %57 : vector<16x1xf32> -> vector<16x1xf32>
    %59 = vector.broadcast %58 : vector<16x1xf32> to vector<16x16xf32>
    %60 = arith.mulf %55, %59 : vector<16x16xf32>
    %61 = arith.truncf %60 : vector<16x16xf32> to vector<16x16xbf16>
    %cst_17 = arith.constant dense<0.000000e+00> : vector<16x32xf32>
    %62 = tpu.matmul %61, %47, %cst_17 {dimension_numbers = #tpu.dot_dimension_numbers<[1], [0], [0], [1], [0, 0, 1, 1], [], []>} : vector<16x16xbf16>, vector<16x32xbf16>, vector<16x32xf32> -> vector<16x32xf32>
    %63 = vector.extract_strided_slice %18 {offsets = [0, 64], sizes = [16, 32], strides = [1, 1]} : vector<32x128xf32> to vector<16x32xf32>
    %64 = arith.truncf %63 : vector<16x32xf32> to vector<16x32xbf16>
    %65 = vector.extract_strided_slice %19 {offsets = [0, 64], sizes = [16, 32], strides = [1, 1]} : vector<32x128xf32> to vector<16x32xf32>
    %66 = arith.truncf %65 : vector<16x32xf32> to vector<16x32xbf16>
    %67 = vector.extract_strided_slice %20 {offsets = [0, 64], sizes = [16, 32], strides = [1, 1]} : vector<32x128xf32> to vector<16x32xf32>
    %68 = arith.truncf %67 : vector<16x32xf32> to vector<16x32xbf16>
    %cst_18 = arith.constant dense<0.000000e+00> : vector<16x16xf32>
    %69 = tpu.matmul %64, %66, %cst_18 {dimension_numbers = #tpu.dot_dimension_numbers<[1], [1], [0], [0], [0, 0, 1, 0], [], []>} : vector<16x32xbf16>, vector<16x32xbf16>, vector<16x16xf32> -> vector<16x16xf32>
    %cst_19 = arith.constant 0.176776692 : f32
    %70 = vector.broadcast %cst_19 : f32 to vector<16x16xf32>
    %71 = arith.mulf %69, %70 : vector<16x16xf32>
    %cst_20 = arith.constant dense<0xFF800000> : vector<16xf32>
    %72 = vector.multi_reduction <maximumf>, %71, %cst_20 [1] : vector<16x16xf32> to vector<16xf32>
    %73 = vector.shape_cast %72 : vector<16xf32> to vector<16x1xf32>
    %74 = vector.broadcast %73 : vector<16x1xf32> to vector<16x16xf32>
    %75 = arith.subf %71, %74 : vector<16x16xf32>
    %76 = math.exp %75 : vector<16x16xf32>
    %cst_21 = arith.constant dense<0.000000e+00> : vector<16xf32>
    %77 = vector.multi_reduction <add>, %76, %cst_21 [1] : vector<16x16xf32> to vector<16xf32>
    %78 = vector.shape_cast %77 : vector<16xf32> to vector<16x1xf32>
    %79 = tpu.reciprocal %78 : vector<16x1xf32> -> vector<16x1xf32>
    %80 = vector.broadcast %79 : vector<16x1xf32> to vector<16x16xf32>
    %81 = arith.mulf %76, %80 : vector<16x16xf32>
    %82 = arith.truncf %81 : vector<16x16xf32> to vector<16x16xbf16>
    %cst_22 = arith.constant dense<0.000000e+00> : vector<16x32xf32>
    %83 = tpu.matmul %82, %68, %cst_22 {dimension_numbers = #tpu.dot_dimension_numbers<[1], [0], [0], [1], [0, 0, 1, 1], [], []>} : vector<16x16xbf16>, vector<16x32xbf16>, vector<16x32xf32> -> vector<16x32xf32>
    %84 = vector.extract_strided_slice %18 {offsets = [0, 96], sizes = [16, 32], strides = [1, 1]} : vector<32x128xf32> to vector<16x32xf32>
    %85 = arith.truncf %84 : vector<16x32xf32> to vector<16x32xbf16>
    %86 = vector.extract_strided_slice %19 {offsets = [0, 96], sizes = [16, 32], strides = [1, 1]} : vector<32x128xf32> to vector<16x32xf32>
    %87 = arith.truncf %86 : vector<16x32xf32> to vector<16x32xbf16>
    %88 = vector.extract_strided_slice %20 {offsets = [0, 96], sizes = [16, 32], strides = [1, 1]} : vector<32x128xf32> to vector<16x32xf32>
    %89 = arith.truncf %88 : vector<16x32xf32> to vector<16x32xbf16>
    %cst_23 = arith.constant dense<0.000000e+00> : vector<16x16xf32>
    %90 = tpu.matmul %85, %87, %cst_23 {dimension_numbers = #tpu.dot_dimension_numbers<[1], [1], [0], [0], [0, 0, 1, 0], [], []>} : vector<16x32xbf16>, vector<16x32xbf16>, vector<16x16xf32> -> vector<16x16xf32>
    %cst_24 = arith.constant 0.176776692 : f32
    %91 = vector.broadcast %cst_24 : f32 to vector<16x16xf32>
    %92 = arith.mulf %90, %91 : vector<16x16xf32>
    %cst_25 = arith.constant dense<0xFF800000> : vector<16xf32>
    %93 = vector.multi_reduction <maximumf>, %92, %cst_25 [1] : vector<16x16xf32> to vector<16xf32>
    %94 = vector.shape_cast %93 : vector<16xf32> to vector<16x1xf32>
    %95 = vector.broadcast %94 : vector<16x1xf32> to vector<16x16xf32>
    %96 = arith.subf %92, %95 : vector<16x16xf32>
    %97 = math.exp %96 : vector<16x16xf32>
    %cst_26 = arith.constant dense<0.000000e+00> : vector<16xf32>
    %98 = vector.multi_reduction <add>, %97, %cst_26 [1] : vector<16x16xf32> to vector<16xf32>
    %99 = vector.shape_cast %98 : vector<16xf32> to vector<16x1xf32>
    %100 = tpu.reciprocal %99 : vector<16x1xf32> -> vector<16x1xf32>
    %101 = vector.broadcast %100 : vector<16x1xf32> to vector<16x16xf32>
    %102 = arith.mulf %97, %101 : vector<16x16xf32>
    %103 = arith.truncf %102 : vector<16x16xf32> to vector<16x16xbf16>
    %cst_27 = arith.constant dense<0.000000e+00> : vector<16x32xf32>
    %104 = tpu.matmul %103, %89, %cst_27 {dimension_numbers = #tpu.dot_dimension_numbers<[1], [0], [0], [1], [0, 0, 1, 1], [], []>} : vector<16x16xbf16>, vector<16x32xbf16>, vector<16x32xf32> -> vector<16x32xf32>
    %105 = tpu.concatenate %41, %62, %83, %104 in 1 : vector<16x32xf32>, vector<16x32xf32>, vector<16x32xf32>, vector<16x32xf32> -> vector<16x128xf32>
    %106 = vector.extract_strided_slice %18 {offsets = [16, 0], sizes = [16, 32], strides = [1, 1]} : vector<32x128xf32> to vector<16x32xf32>
    %107 = arith.truncf %106 : vector<16x32xf32> to vector<16x32xbf16>
    %108 = vector.extract_strided_slice %19 {offsets = [16, 0], sizes = [16, 32], strides = [1, 1]} : vector<32x128xf32> to vector<16x32xf32>
    %109 = arith.truncf %108 : vector<16x32xf32> to vector<16x32xbf16>
    %110 = vector.extract_strided_slice %20 {offsets = [16, 0], sizes = [16, 32], strides = [1, 1]} : vector<32x128xf32> to vector<16x32xf32>
    %111 = arith.truncf %110 : vector<16x32xf32> to vector<16x32xbf16>
    %cst_28 = arith.constant dense<0.000000e+00> : vector<16x16xf32>
    %112 = tpu.matmul %107, %109, %cst_28 {dimension_numbers = #tpu.dot_dimension_numbers<[1], [1], [0], [0], [0, 0, 1, 0], [], []>} : vector<16x32xbf16>, vector<16x32xbf16>, vector<16x16xf32> -> vector<16x16xf32>
    %cst_29 = arith.constant 0.176776692 : f32
    %113 = vector.broadcast %cst_29 : f32 to vector<16x16xf32>
    %114 = arith.mulf %112, %113 : vector<16x16xf32>
    %cst_30 = arith.constant dense<0xFF800000> : vector<16xf32>
    %115 = vector.multi_reduction <maximumf>, %114, %cst_30 [1] : vector<16x16xf32> to vector<16xf32>
    %116 = vector.shape_cast %115 : vector<16xf32> to vector<16x1xf32>
    %117 = vector.broadcast %116 : vector<16x1xf32> to vector<16x16xf32>
    %118 = arith.subf %114, %117 : vector<16x16xf32>
    %119 = math.exp %118 : vector<16x16xf32>
    %cst_31 = arith.constant dense<0.000000e+00> : vector<16xf32>
    %120 = vector.multi_reduction <add>, %119, %cst_31 [1] : vector<16x16xf32> to vector<16xf32>
    %121 = vector.shape_cast %120 : vector<16xf32> to vector<16x1xf32>
    %122 = tpu.reciprocal %121 : vector<16x1xf32> -> vector<16x1xf32>
    %123 = vector.broadcast %122 : vector<16x1xf32> to vector<16x16xf32>
    %124 = arith.mulf %119, %123 : vector<16x16xf32>
    %125 = arith.truncf %124 : vector<16x16xf32> to vector<16x16xbf16>
    %cst_32 = arith.constant dense<0.000000e+00> : vector<16x32xf32>
    %126 = tpu.matmul %125, %111, %cst_32 {dimension_numbers = #tpu.dot_dimension_numbers<[1], [0], [0], [1], [0, 0, 1, 1], [], []>} : vector<16x16xbf16>, vector<16x32xbf16>, vector<16x32xf32> -> vector<16x32xf32>
    %127 = vector.extract_strided_slice %18 {offsets = [16, 32], sizes = [16, 32], strides = [1, 1]} : vector<32x128xf32> to vector<16x32xf32>
    %128 = arith.truncf %127 : vector<16x32xf32> to vector<16x32xbf16>
    %129 = vector.extract_strided_slice %19 {offsets = [16, 32], sizes = [16, 32], strides = [1, 1]} : vector<32x128xf32> to vector<16x32xf32>
    %130 = arith.truncf %129 : vector<16x32xf32> to vector<16x32xbf16>
    %131 = vector.extract_strided_slice %20 {offsets = [16, 32], sizes = [16, 32], strides = [1, 1]} : vector<32x128xf32> to vector<16x32xf32>
    %132 = arith.truncf %131 : vector<16x32xf32> to vector<16x32xbf16>
    %cst_33 = arith.constant dense<0.000000e+00> : vector<16x16xf32>
    %133 = tpu.matmul %128, %130, %cst_33 {dimension_numbers = #tpu.dot_dimension_numbers<[1], [1], [0], [0], [0, 0, 1, 0], [], []>} : vector<16x32xbf16>, vector<16x32xbf16>, vector<16x16xf32> -> vector<16x16xf32>
    %cst_34 = arith.constant 0.176776692 : f32
    %134 = vector.broadcast %cst_34 : f32 to vector<16x16xf32>
    %135 = arith.mulf %133, %134 : vector<16x16xf32>
    %cst_35 = arith.constant dense<0xFF800000> : vector<16xf32>
    %136 = vector.multi_reduction <maximumf>, %135, %cst_35 [1] : vector<16x16xf32> to vector<16xf32>
    %137 = vector.shape_cast %136 : vector<16xf32> to vector<16x1xf32>
    %138 = vector.broadcast %137 : vector<16x1xf32> to vector<16x16xf32>
    %139 = arith.subf %135, %138 : vector<16x16xf32>
    %140 = math.exp %139 : vector<16x16xf32>
    %cst_36 = arith.constant dense<0.000000e+00> : vector<16xf32>
    %141 = vector.multi_reduction <add>, %140, %cst_36 [1] : vector<16x16xf32> to vector<16xf32>
    %142 = vector.shape_cast %141 : vector<16xf32> to vector<16x1xf32>
    %143 = tpu.reciprocal %142 : vector<16x1xf32> -> vector<16x1xf32>
    %144 = vector.broadcast %143 : vector<16x1xf32> to vector<16x16xf32>
    %145 = arith.mulf %140, %144 : vector<16x16xf32>
    %146 = arith.truncf %145 : vector<16x16xf32> to vector<16x16xbf16>
    %cst_37 = arith.constant dense<0.000000e+00> : vector<16x32xf32>
    %147 = tpu.matmul %146, %132, %cst_37 {dimension_numbers = #tpu.dot_dimension_numbers<[1], [0], [0], [1], [0, 0, 1, 1], [], []>} : vector<16x16xbf16>, vector<16x32xbf16>, vector<16x32xf32> -> vector<16x32xf32>
    %148 = vector.extract_strided_slice %18 {offsets = [16, 64], sizes = [16, 32], strides = [1, 1]} : vector<32x128xf32> to vector<16x32xf32>
    %149 = arith.truncf %148 : vector<16x32xf32> to vector<16x32xbf16>
    %150 = vector.extract_strided_slice %19 {offsets = [16, 64], sizes = [16, 32], strides = [1, 1]} : vector<32x128xf32> to vector<16x32xf32>
    %151 = arith.truncf %150 : vector<16x32xf32> to vector<16x32xbf16>
    %152 = vector.extract_strided_slice %20 {offsets = [16, 64], sizes = [16, 32], strides = [1, 1]} : vector<32x128xf32> to vector<16x32xf32>
    %153 = arith.truncf %152 : vector<16x32xf32> to vector<16x32xbf16>
    %cst_38 = arith.constant dense<0.000000e+00> : vector<16x16xf32>
    %154 = tpu.matmul %149, %151, %cst_38 {dimension_numbers = #tpu.dot_dimension_numbers<[1], [1], [0], [0], [0, 0, 1, 0], [], []>} : vector<16x32xbf16>, vector<16x32xbf16>, vector<16x16xf32> -> vector<16x16xf32>
    %cst_39 = arith.constant 0.176776692 : f32
    %155 = vector.broadcast %cst_39 : f32 to vector<16x16xf32>
    %156 = arith.mulf %154, %155 : vector<16x16xf32>
    %cst_40 = arith.constant dense<0xFF800000> : vector<16xf32>
    %157 = vector.multi_reduction <maximumf>, %156, %cst_40 [1] : vector<16x16xf32> to vector<16xf32>
    %158 = vector.shape_cast %157 : vector<16xf32> to vector<16x1xf32>
    %159 = vector.broadcast %158 : vector<16x1xf32> to vector<16x16xf32>
    %160 = arith.subf %156, %159 : vector<16x16xf32>
    %161 = math.exp %160 : vector<16x16xf32>
    %cst_41 = arith.constant dense<0.000000e+00> : vector<16xf32>
    %162 = vector.multi_reduction <add>, %161, %cst_41 [1] : vector<16x16xf32> to vector<16xf32>
    %163 = vector.shape_cast %162 : vector<16xf32> to vector<16x1xf32>
    %164 = tpu.reciprocal %163 : vector<16x1xf32> -> vector<16x1xf32>
    %165 = vector.broadcast %164 : vector<16x1xf32> to vector<16x16xf32>
    %166 = arith.mulf %161, %165 : vector<16x16xf32>
    %167 = arith.truncf %166 : vector<16x16xf32> to vector<16x16xbf16>
    %cst_42 = arith.constant dense<0.000000e+00> : vector<16x32xf32>
    %168 = tpu.matmul %167, %153, %cst_42 {dimension_numbers = #tpu.dot_dimension_numbers<[1], [0], [0], [1], [0, 0, 1, 1], [], []>} : vector<16x16xbf16>, vector<16x32xbf16>, vector<16x32xf32> -> vector<16x32xf32>
    %169 = vector.extract_strided_slice %18 {offsets = [16, 96], sizes = [16, 32], strides = [1, 1]} : vector<32x128xf32> to vector<16x32xf32>
    %170 = arith.truncf %169 : vector<16x32xf32> to vector<16x32xbf16>
    %171 = vector.extract_strided_slice %19 {offsets = [16, 96], sizes = [16, 32], strides = [1, 1]} : vector<32x128xf32> to vector<16x32xf32>
    %172 = arith.truncf %171 : vector<16x32xf32> to vector<16x32xbf16>
    %173 = vector.extract_strided_slice %20 {offsets = [16, 96], sizes = [16, 32], strides = [1, 1]} : vector<32x128xf32> to vector<16x32xf32>
    %174 = arith.truncf %173 : vector<16x32xf32> to vector<16x32xbf16>
    %cst_43 = arith.constant dense<0.000000e+00> : vector<16x16xf32>
    %175 = tpu.matmul %170, %172, %cst_43 {dimension_numbers = #tpu.dot_dimension_numbers<[1], [1], [0], [0], [0, 0, 1, 0], [], []>} : vector<16x32xbf16>, vector<16x32xbf16>, vector<16x16xf32> -> vector<16x16xf32>
    %cst_44 = arith.constant 0.176776692 : f32
    %176 = vector.broadcast %cst_44 : f32 to vector<16x16xf32>
    %177 = arith.mulf %175, %176 : vector<16x16xf32>
    %cst_45 = arith.constant dense<0xFF800000> : vector<16xf32>
    %178 = vector.multi_reduction <maximumf>, %177, %cst_45 [1] : vector<16x16xf32> to vector<16xf32>
    %179 = vector.shape_cast %178 : vector<16xf32> to vector<16x1xf32>
    %180 = vector.broadcast %179 : vector<16x1xf32> to vector<16x16xf32>
    %181 = arith.subf %177, %180 : vector<16x16xf32>
    %182 = math.exp %181 : vector<16x16xf32>
    %cst_46 = arith.constant dense<0.000000e+00> : vector<16xf32>
    %183 = vector.multi_reduction <add>, %182, %cst_46 [1] : vector<16x16xf32> to vector<16xf32>
    %184 = vector.shape_cast %183 : vector<16xf32> to vector<16x1xf32>
    %185 = tpu.reciprocal %184 : vector<16x1xf32> -> vector<16x1xf32>
    %186 = vector.broadcast %185 : vector<16x1xf32> to vector<16x16xf32>
    %187 = arith.mulf %182, %186 : vector<16x16xf32>
    %188 = arith.truncf %187 : vector<16x16xf32> to vector<16x16xbf16>
    %cst_47 = arith.constant dense<0.000000e+00> : vector<16x32xf32>
    %189 = tpu.matmul %188, %174, %cst_47 {dimension_numbers = #tpu.dot_dimension_numbers<[1], [0], [0], [1], [0, 0, 1, 1], [], []>} : vector<16x16xbf16>, vector<16x32xbf16>, vector<16x32xf32> -> vector<16x32xf32>
    %190 = tpu.concatenate %126, %147, %168, %189 in 1 : vector<16x32xf32>, vector<16x32xf32>, vector<16x32xf32>, vector<16x32xf32> -> vector<16x128xf32>
    %191 = tpu.concatenate %105, %190 in 0 : vector<16x128xf32>, vector<16x128xf32> -> vector<32x128xf32>
    %192 = arith.truncf %191 : vector<32x128xf32> to vector<32x128xbf16>
    %c0_48 = arith.constant 0 : index
    %c0_49 = arith.constant 0 : index
    %c0_50 = arith.constant 0 : index
    %193 = vector.load %arg4[%c0_48, %c0_49, %c0_50] : memref<1x128x128xbf16, #tpu.memory_space<vmem>>, vector<1x128x128xbf16>
    %194 = vector.shape_cast %193 : vector<1x128x128xbf16> to vector<128x128xbf16>
    %cst_51 = arith.constant dense<0.000000e+00> : vector<32x128xf32>
    %195 = tpu.matmul %192, %194, %cst_51 {dimension_numbers = #tpu.dot_dimension_numbers<[1], [0], [0], [1], [0, 0, 1, 1], [], []>} : vector<32x128xbf16>, vector<128x128xbf16>, vector<32x128xf32> -> vector<32x128xf32>
    %196 = arith.addf %3, %195 : vector<32x128xf32>
    %197 = arith.mulf %196, %196 : vector<32x128xf32>
    %cst_52 = arith.constant dense<0.000000e+00> : vector<32xf32>
    %198 = vector.multi_reduction <add>, %197, %cst_52 [1] : vector<32x128xf32> to vector<32xf32>
    %199 = vector.shape_cast %198 : vector<32xf32> to vector<32x1xf32>
    %cst_53 = arith.constant 1.280000e+02 : f32
    %200 = vector.broadcast %cst_53 : f32 to vector<32x1xf32>
    %201 = arith.divf %199, %200 : vector<32x1xf32>
    %cst_54 = arith.constant 9.99999997E-7 : f32
    %202 = vector.broadcast %cst_54 : f32 to vector<32x1xf32>
    %203 = arith.addf %201, %202 : vector<32x1xf32>
    %204 = math.rsqrt %203 : vector<32x1xf32>
    %205 = vector.broadcast %204 : vector<32x1xf32> to vector<32x128xf32>
    %206 = arith.mulf %196, %205 : vector<32x128xf32>
    %207 = arith.truncf %206 : vector<32x128xf32> to vector<32x128xbf16>
    %c0_55 = arith.constant 0 : index
    %c0_56 = arith.constant 0 : index
    %c0_57 = arith.constant 0 : index
    %208 = vector.load %arg5[%c0_55, %c0_56, %c0_57] : memref<1x128x512xbf16, #tpu.memory_space<vmem>>, vector<1x128x512xbf16>
    %209 = vector.shape_cast %208 : vector<1x128x512xbf16> to vector<128x512xbf16>
    %cst_58 = arith.constant dense<0.000000e+00> : vector<32x512xf32>
    %210 = tpu.matmul %207, %209, %cst_58 {dimension_numbers = #tpu.dot_dimension_numbers<[1], [0], [0], [1], [0, 0, 1, 1], [], []>} : vector<32x128xbf16>, vector<128x512xbf16>, vector<32x512xf32> -> vector<32x512xf32>
    %211 = vector.extract_strided_slice %210 {offsets = [0, 0], sizes = [32, 256], strides = [1, 1]} : vector<32x512xf32> to vector<32x256xf32>
    %212 = arith.negf %211 : vector<32x256xf32>
    %213 = math.exp %212 : vector<32x256xf32>
    %cst_59 = arith.constant 1.000000e+00 : f32
    %214 = vector.broadcast %cst_59 : f32 to vector<32x256xf32>
    %215 = arith.addf %214, %213 : vector<32x256xf32>
    %216 = arith.divf %214, %215 : vector<32x256xf32>
    %217 = arith.mulf %211, %216 : vector<32x256xf32>
    %218 = vector.extract_strided_slice %210 {offsets = [0, 256], sizes = [32, 256], strides = [1, 1]} : vector<32x512xf32> to vector<32x256xf32>
    %219 = arith.mulf %217, %218 : vector<32x256xf32>
    %220 = arith.truncf %219 : vector<32x256xf32> to vector<32x256xbf16>
    %c0_60 = arith.constant 0 : index
    %c0_61 = arith.constant 0 : index
    %c0_62 = arith.constant 0 : index
    %221 = vector.load %arg6[%c0_60, %c0_61, %c0_62] : memref<1x256x128xbf16, #tpu.memory_space<vmem>>, vector<1x256x128xbf16>
    %222 = vector.shape_cast %221 : vector<1x256x128xbf16> to vector<256x128xbf16>
    %cst_63 = arith.constant dense<0.000000e+00> : vector<32x128xf32>
    %223 = tpu.matmul %220, %222, %cst_63 {dimension_numbers = #tpu.dot_dimension_numbers<[1], [0], [0], [1], [0, 0, 1, 1], [], []>} : vector<32x256xbf16>, vector<256x128xbf16>, vector<32x128xf32> -> vector<32x128xf32>
    %224 = arith.addf %196, %223 : vector<32x128xf32>
    %c0_64 = arith.constant 0 : index
    %c0_65 = arith.constant 0 : index
    %225 = vector.load %arg8[%c0_64, %c0_65] : memref<32x128xf32, #tpu.memory_space<vmem>>, vector<32x128xf32>
    tpu.vector_store %arg8[%c0_64, %c0_65], %224 {strides = array<i32>} : memref<32x128xf32, #tpu.memory_space<vmem>>, vector<32x128xf32>,
    %c1_i32 = arith.constant 1 : i32
    %226 = arith.cmpi eq, %arg0, %c1_i32 : i32
    %227 = arith.extui %226 : i1 to i32
    %c0_i32_66 = arith.constant 0 : i32
    %228 = arith.cmpi ne, %227, %c0_i32_66 : i32
    scf.if %228 {
      %229 = arith.mulf %224, %224 : vector<32x128xf32>
      %cst_67 = arith.constant dense<0.000000e+00> : vector<32xf32>
      %230 = vector.multi_reduction <add>, %229, %cst_67 [1] : vector<32x128xf32> to vector<32xf32>
      %231 = vector.shape_cast %230 : vector<32xf32> to vector<32x1xf32>
      %cst_68 = arith.constant 1.280000e+02 : f32
      %232 = vector.broadcast %cst_68 : f32 to vector<32x1xf32>
      %233 = arith.divf %231, %232 : vector<32x1xf32>
      %cst_69 = arith.constant 9.99999997E-7 : f32
      %234 = vector.broadcast %cst_69 : f32 to vector<32x1xf32>
      %235 = arith.addf %233, %234 : vector<32x1xf32>
      %236 = math.rsqrt %235 : vector<32x1xf32>
      %237 = vector.broadcast %236 : vector<32x1xf32> to vector<32x128xf32>
      %238 = arith.mulf %224, %237 : vector<32x128xf32>
      %c0_70 = arith.constant 0 : index
      %c0_71 = arith.constant 0 : index
      %239 = vector.load %arg2[%c0_70, %c0_71] : memref<1x128xf32, #tpu.memory_space<vmem>>, vector<1x128xf32>
      %240 = vector.broadcast %239 : vector<1x128xf32> to vector<32x128xf32>
      %241 = arith.mulf %238, %240 : vector<32x128xf32>
      %c0_72 = arith.constant 0 : index
      %c0_73 = arith.constant 0 : index
      %242 = vector.load %arg7[%c0_72, %c0_73] : memref<32x128xf32, #tpu.memory_space<vmem>>, vector<32x128xf32>
      tpu.vector_store %arg7[%c0_72, %c0_73], %241 {strides = array<i32>} : memref<32x128xf32, #tpu.memory_space<vmem>>, vector<32x128xf32>,
    } else {
    }
    return
  }
  func.func @transform_0(%arg0: i32) -> (i32, i32) {
    %c0_i32 = arith.constant 0 : i32
    %c0_i32_0 = arith.constant 0 : i32
    %c0_i32_1 = arith.constant 0 : i32
    return %c0_i32, %c0_i32_0 : i32, i32
  }
  func.func @transform_1(%arg0: i32) -> (i32, i32) {
    %c0_i32 = arith.constant 0 : i32
    %c0_i32_0 = arith.constant 0 : i32
    %c0_i32_1 = arith.constant 0 : i32
    return %c0_i32, %c0_i32_0 : i32, i32
  }
  func.func @transform_2(%arg0: i32) -> (i32, i32, i32) {
    %c0_i32 = arith.constant 0 : i32
    %c0_i32_0 = arith.constant 0 : i32
    %c0_i32_1 = arith.constant 0 : i32
    return %arg0, %c0_i32, %c0_i32_0 : i32, i32, i32
  }
  func.func @transform_3(%arg0: i32) -> (i32, i32, i32) {
    %c0_i32 = arith.constant 0 : i32
    %c0_i32_0 = arith.constant 0 : i32
    %c0_i32_1 = arith.constant 0 : i32
    return %arg0, %c0_i32, %c0_i32_0 : i32, i32, i32
  }
  func.func @transform_4(%arg0: i32) -> (i32, i32, i32) {
    %c0_i32 = arith.constant 0 : i32
    %c0_i32_0 = arith.constant 0 : i32
    %c0_i32_1 = arith.constant 0 : i32
    return %arg0, %c0_i32, %c0_i32_0 : i32, i32, i32
  }
  func.func @transform_5(%arg0: i32) -> (i32, i32, i32) {
    %c0_i32 = arith.constant 0 : i32
    %c0_i32_0 = arith.constant 0 : i32
    %c0_i32_1 = arith.constant 0 : i32
    return %arg0, %c0_i32, %c0_i32_0 : i32, i32, i32
  }
  func.func @transform_6(%arg0: i32) -> (i32, i32) {
    %c0_i32 = arith.constant 0 : i32
    %c0_i32_0 = arith.constant 0 : i32
    %c0_i32_1 = arith.constant 0 : i32
    return %c0_i32, %c0_i32_0 : i32, i32
  }
}

</mosaic_0001>

<bundles_post_ra>
// kernel: transformer_forward.1
= control target key start
LH: loop header
LB: loop body
LE: loop exit
PB: predicated region body
PF: predicated region fallthrough
CT: control target
= control target key end

     0   :  { %s4273_s0 = inlined_call_operand.hbm [shape: f32[32,128], index: 0, kind: input, shape index: {}]   ;;  %s4274_s1 = inlined_call_operand.vmem [shape: f32[1,128], index: 1, kind: input, shape index: {}]   ;;  %s4275_s2 = inlined_call_operand.hbm [shape: bf16[2,128,384], index: 2, kind: input, shape index: {}]   ;;  %s4276_s3 = inlined_call_operand.hbm [shape: bf16[2,128,128], index: 3, kind: input, shape index: {}]   ;;  %s4277_s4 = inlined_call_operand.hbm [shape: bf16[2,128,512], index: 4, kind: input, shape index: {}]   ;;  %s4278_s5 = inlined_call_operand.hbm [shape: bf16[2,256,128], index: 5, kind: input, shape index: {}]   ;;  %s4279_s6 = inlined_call_operand.hbm [shape: f32[32,128], index: 6, kind: output, shape index: {}]  }
   0x1   :  { %4284 = sst [smem:[#allocation19_spill]] %s4275_s2 }
   0x2   :  { %4285 = sst [smem:[#allocation20_spill]] %s4277_s4 }
   0x3   :  { %11 = vsyncpa [#allocation4], 0 }
   0x4   :  { %12 = vsyncpa [#allocation7], 0 }
   0x5   :  { %14 = vsyncpa [#allocation7 + $0x1], 0 }
   0x6   :  { %15 = vsyncpa [#allocation10], 0 }
   0x7   :  { %17 = vsyncpa [#allocation10 + $0x1], 0 }
   0x8   :  { %18 = vsyncpa [#allocation5], 0  ;;  %s3589_s21 = smov 0   ;;  %s3591_s22 = smov 0  }
   0x9   :  { %s3593_s23 = smov 0   ;;  %s3595_s24 = smov 0  }
   0xa LB: > { %4286 = sst [smem:[#allocation17_spill]] %s3526_s23  ;;  %s3610_s25 = sadd.s32 1, %s3530_s24   ;;  %s3530_s24 = sphi %s3595_s24, %s4304_s24   ;;  %s3526_s23 = sphi %s3593_s23, %s4301_s23   ;;  %s3522_s22 = sphi %s3591_s22, %s4303_s22   ;;  %s3518_s21 = sphi %s3589_s21, %s4302_s21  }
   0xb   : > { %s73_s26 = sadd.s32 1, %s3526_s23  ;;  %s70_s27 = ssub.s32 %s3530_s24, %s3610_s25 }
   0xc   : > { %p80_p0 = scmp.ne.s32.totalorder %s3526_s23, %s3522_s22  ;;  %p71_p1 = scmp.eq.s32.totalorder %s70_s27, 0 }
   0xd   : > { %p81_p2 = scmp.eq.s32.totalorder %s3530_s24, 0  ;;  %p3010_p3 = scmp.lt.s32.totalorder %s3530_s24, 2 }
   0xe   : > { %s3620_s28 = scalar_select %p71_p1, %s3526_s23, %s73_s26  }
   0xf   : > { %p82_p4 = por %p81_p2, %p80_p0  ;;  %s225_s29 = sand.u32 1, %s3530_s24  }
  0x10   : > { %4287 = sst [smem:[#allocation18_spill]] %s3620_s28  ;;  %s3624_s30 = sand.u32 1, %s3526_s23  }
  0x11   : > { %s2973_s7 = smul.u32 192, %s3624_s30  ;;  %p3627_p5 = pnand %p3010_p3, %p82_p4 }
  0x12   : > { %s2974_s9 = smul.u32 3072, %s3530_s24  ;;  %s4289_s2 = sld [smem:[#allocation19_spill]] }
  0x13   : > { %s229_s13 = scalar_lea.vmem [#allocation6], %s2973_s7  ;;  %s3641_s15 = scalar_lea.sflag [#allocation7], %s225_s29 }
  0x14   : > { %s236_s14 = sshll.u32 %s229_s13, 4  ;;  %p3647_p7 = pneg %p3627_p5  ;;  %s3637_s14 = int_to_ptr.vmem [resolvable:$true] %s236_s14 }
  0x18   : > { %s3635_s12 = scalar_lea.hbm %s4289_s2, %s2974_s9  ;;  %s3327_s20 = scalar_lea.hbm %s4289_s2, 6144 }
  0x19   : > { %s3322_s16 = scalar_lea.hbm %s3635_s12, 3072  ;;  %p3328_p10 = scmp.lt.s32.totalorder %s3635_s12, %s4289_s2 }
  0x1a   : > { %p3323_p6 = scmp.ne.s32.totalorder %s3635_s12, %s3322_s16  ;;  %p3329_p11 = scmp.lt.s32.totalorder %s3327_s20, %s3322_s16 }
  0x1c   : > { %p3325_p8 = pnand %p3647_p7, %p3323_p6  ;;  %p3330_p12 = por %p3329_p11, %p3328_p10 }
  0x1e   : > { %p3326_p9 = pneg %p3325_p8 }
  0x20   : > { %p3331_p13 = pnand %p3330_p12, %p3326_p9 }
  0x22   : > { %3334 = shalt.err (!%p3331_p13)
}
  0x23   : > { %s3335_s7 = scalar_lea.vmem %s3637_s14, 3072  ;;  %s3532_s9 = smov [#allocation6]  }
  0x24   : > { %p3336_p0 = scmp.ne.s32.totalorder %s3637_s14, %s3335_s7  ;;  %s3340_s10 = sshll.u32 %s3532_s9, 4  ;;  %s3341_s10 = int_to_ptr.vmem [resolvable:$false] %s3340_s10 }
  0x25   : > { %s3342_s11 = scalar_lea.vmem %s3341_s10, 6144  ;;  %p3343_p3 = scmp.lt.s32.totalorder %s3637_s14, %s3341_s10 }
  0x26   : > { %p3338_p1 = pnand %p3336_p0, %p3647_p7  ;;  %p3344_p4 = scmp.lt.s32.totalorder %s3342_s11, %s3335_s7 }
  0x28   : > { %p3339_p2 = pneg %p3338_p1  ;;  %p3345_p6 = por %p3344_p4, %p3343_p3 }
  0x2a   : > { %p3346_p8 = pnand %p3345_p6, %p3339_p2 }
  0x2c   : > { %3349 = shalt.err (!%p3346_p8)
}
  0x2d   : > { %s3533_s13 = smov 192   ;;  %s3534_s16 = smov 12  }
  0x2e   : > { %2999 = dma.hbm_to_vmem [thread:$0]  (!%p3627_p5), %s3635_s12, 3072, %s3637_s14, %s3641_s15, %s3533_s13, %s3533_s13, %s3534_s16  }
  0x2f   : > { %s2632_s18 = sshll.u32 %s3624_s30, 8  ;;  %s2755_s19 = sshll.u32 %s3530_s24, 12 }
  0x30   : > { %s4291_s4 = sld [smem:[#allocation20_spill]]  ;;  %s271_s7 = scalar_lea.vmem [#allocation9], %s2632_s18 }
  0x31   : > { %s278_s9 = sshll.u32 %s271_s7, 4  ;;  %s3681_s10 = scalar_lea.sflag [#allocation10], %s225_s29  ;;  %s3677_s9 = int_to_ptr.vmem [resolvable:$true] %s278_s9 }
  0x36   : > { %s3675_s27 = scalar_lea.hbm %s4291_s4, %s2755_s19  ;;  %s3355_s13 = scalar_lea.hbm %s4291_s4, 8192 }
  0x37   : > { %s3350_s11 = scalar_lea.hbm %s3675_s27, 4096  ;;  %p3356_p12 = scmp.lt.s32.totalorder %s3675_s27, %s4291_s4 }
  0x38   : > { %p3351_p9 = scmp.ne.s32.totalorder %s3675_s27, %s3350_s11  ;;  %p3357_p13 = scmp.lt.s32.totalorder %s3355_s13, %s3350_s11 }
  0x3a   : > { %p3353_p10 = pnand %p3351_p9, %p3647_p7  ;;  %p3358_p0 = por %p3357_p13, %p3356_p12 }
  0x3c   : > { %p3354_p11 = pneg %p3353_p10 }
  0x3e   : > { %p3359_p1 = pnand %p3358_p0, %p3354_p11 }
  0x40   : > { %3362 = shalt.err (!%p3359_p1)
}
  0x41   : > { %s3363_s29 = scalar_lea.vmem %s3677_s9, 4096  ;;  %s3535_s18 = smov [#allocation9]  }
  0x42   : > { %p3364_p2 = scmp.ne.s32.totalorder %s3677_s9, %s3363_s29  ;;  %s3368_s20 = sshll.u32 %s3535_s18, 4  ;;  %s3369_s20 = int_to_ptr.vmem [resolvable:$false] %s3368_s20 }
  0x43   : > { %s3370_s26 = scalar_lea.vmem %s3369_s20, 8192  ;;  %p3371_p6 = scmp.lt.s32.totalorder %s3677_s9, %s3369_s20 }
  0x44   : > { %p3366_p3 = pnand %p3364_p2, %p3647_p7  ;;  %p3372_p8 = scmp.lt.s32.totalorder %s3370_s26, %s3363_s29 }
  0x46   : > { %p3367_p4 = pneg %p3366_p3  ;;  %p3373_p9 = por %p3372_p8, %p3371_p6 }
  0x48   : > { %p3374_p10 = pnand %p3373_p9, %p3367_p4 }
  0x4a   : > { %3377 = shalt.err (!%p3374_p10)
}
  0x4b   : > { %s3536_s7 = smov 256   ;;  %s3537_s11 = smov 16  }
  0x4c   : > { %3005 = dma.hbm_to_vmem [thread:$0]  (!%p3627_p5), %s3675_s27, 4096, %s3677_s9, %s3681_s10, %s3536_s7, %s3536_s7, %s3537_s11  }
  0x4d   : > { %s3705_s12 = sadd.s32 4294967295, %s3530_s24   ;;  %p86_p11 = scmp.ne.s32.totalorder %s3522_s22, %s3518_s21 }
  0x4e   : > { %p4281_p12 = scmp.eq.s32.totalorder %s3705_s12, 0  ;;  %p2625_p13 = scmp.ge.s32.totalorder %s3530_s24, 1 }
  0x4f   : > { %p196_p0 = scmp.lt.s32.totalorder %s3530_s24, 3  ;;  %s3538_s27 = smov [#allocation3]  }
  0x50   : > { %p3714_p1 = por %p4281_p12, %p86_p11  ;;  %s208_s9 = sshll.u32 %s3538_s27, 4  ;;  %s209_s9 = int_to_ptr.vmem [resolvable:$true] %s208_s9 }
  0x51   : > { %p3719_p3 = pnand %p2625_p13, %p196_p0  ;;  %s2629_s21 = sshll.u32 %s3624_s30, 6 }
  0x52   : > { %s4292_s14 = scalar_select %p3714_p1, 1, 0 }
  0x53   : > { %s4293_s13 = scalar_select %p3719_p3, 1, 0 }
  0x54   : > { %p2992_p4 = pneg %p3719_p3  ;;  %s2754_s19 = sshll.u32 %s3530_s24, 10 }
  0x55   : > { %s250_s29 = scalar_lea.vmem [#allocation8], %s2629_s21  ;;  %s3736_s7 = scalar_lea.hbm %s4276_s3, %s2754_s19 }
  0x56   : > { %p3728_p6 = pnand %p2992_p4, %p4281_p12  ;;  %s257_s18 = sshll.u32 %s250_s29, 4  ;;  %s3745_s18 = int_to_ptr.vmem [resolvable:$true] %s257_s18 }
  0x57   : > { %s3389_s11 = scalar_lea.vmem %s209_s9, 512  ;;  %p3397_p13 = scmp.lt.s32.totalorder %s209_s9, %s209_s9 }
  0x58   : > { %p3380_p8 = pneg %p3728_p6  ;;  %p3390_p9 = scmp.ne.s32.totalorder %s209_s9, %s3389_s11 }
  0x59   : > { %p3398_p0 = scmp.lt.s32.totalorder %s3389_s11, %s3389_s11 }
  0x5a   : > { %p3392_p10 = pnand %p3390_p9, %p3380_p8 }
  0x5b   : > { %p3399_p4 = por %p3398_p0, %p3397_p13 }
  0x5c   : > { %p3393_p11 = pneg %p3392_p10 }
  0x5e   : > { %p3400_p2 = pnand %p3399_p4, %p3393_p11 }
  0x60   : > { %3403 = shalt.err (!%p3400_p2)
}
  0x61   : > { %s3539_s27 = smov 128   ;;  %s3540_s21 = smov 8  }
  0x62   : > { %2995 = dma.hbm_to_vmem [thread:$0]  (!%p3728_p6), %s4273_s0, 512, %s209_s9, [#allocation4], %s3539_s27, %s3539_s27, %s3540_s21  }
  0x63   : > { %s2635_s20 = sshll.u32 %s3624_s30, 7  ;;  %s3404_s26 = scalar_lea.hbm %s3736_s7, 1024 }
  0x64   : > { %p3405_p8 = scmp.ne.s32.totalorder %s3736_s7, %s3404_s26  ;;  %s3409_s4 = scalar_lea.hbm %s4276_s3, 2048 }
  0x65   : > { %p3410_p10 = scmp.lt.s32.totalorder %s3736_s7, %s4276_s3  ;;  %p3411_p11 = scmp.lt.s32.totalorder %s3409_s4, %s3404_s26 }
  0x66   : > { %p3407_p2 = pnand %p3405_p8, %p3647_p7 }
  0x67   : > { %p3412_p13 = por %p3411_p11, %p3410_p10 }
  0x68   : > { %p3408_p9 = pneg %p3407_p2 }
  0x6a   : > { %p3413_p0 = pnand %p3412_p13, %p3408_p9 }
  0x6c   : > { %3416 = shalt.err (!%p3413_p0)
}
  0x6d   : > { %s3417_s9 = scalar_lea.vmem %s3745_s18, 1024  ;;  %s3541_s16 = smov [#allocation8]  }
  0x6e   : > { %p3418_p6 = scmp.ne.s32.totalorder %s3745_s18, %s3417_s9  ;;  %s3422_s2 = sshll.u32 %s3541_s16, 4  ;;  %s3423_s2 = int_to_ptr.vmem [resolvable:$false] %s3422_s2 }
  0x6f   : > { %s3424_s27 = scalar_lea.vmem %s3423_s2, 2048  ;;  %p3425_p2 = scmp.lt.s32.totalorder %s3745_s18, %s3423_s2 }
  0x70   : > { %p3420_p4 = pnand %p3418_p6, %p3647_p7  ;;  %p3426_p12 = scmp.lt.s32.totalorder %s3424_s27, %s3417_s9 }
  0x72   : > { %p3421_p8 = pneg %p3420_p4  ;;  %p3427_p1 = por %p3426_p12, %p3425_p2 }
  0x74   : > { %p3428_p3 = pnand %p3427_p1, %p3421_p8 }
  0x76   : > { %3431 = shalt.err (!%p3428_p3)
}
  0x77   : > { %s3542_s4 = smov 64   ;;  %s3543_s23 = smov 4  }
  0x78   : > { %3002 = dma.hbm_to_vmem [thread:$0]  (!%p3627_p5), %s3736_s7, 1024, %s3745_s18, %s3641_s15, %s3542_s4, %s3542_s4, %s3543_s23  }
  0x79   : > { %s2756_s28 = sshll.u32 %s3530_s24, 11  ;;  %s292_s26 = scalar_lea.vmem [#allocation11], %s2635_s20 }
  0x7a   : > { %s3776_s29 = scalar_lea.hbm %s4278_s5, %s2756_s28  ;;  %s299_s11 = sshll.u32 %s292_s26, 4  ;;  %s300_s11 = int_to_ptr.vmem [resolvable:$true] %s299_s11 }
  0x7b   : > { %s3432_s9 = scalar_lea.hbm %s3776_s29, 2048  ;;  %s3437_s24 = scalar_lea.hbm %s4278_s5, 4096 }
  0x7c   : > { %p3433_p12 = scmp.ne.s32.totalorder %s3776_s29, %s3432_s9  ;;  %p3438_p9 = scmp.lt.s32.totalorder %s3776_s29, %s4278_s5 }
  0x7d   : > { %p3439_p10 = scmp.lt.s32.totalorder %s3437_s24, %s3432_s9 }
  0x7e   : > { %p3435_p1 = pnand %p3433_p12, %p3647_p7 }
  0x7f   : > { %p3440_p11 = por %p3439_p10, %p3438_p9 }
  0x80   : > { %p3436_p3 = pneg %p3435_p1 }
  0x82   : > { %p3441_p13 = pnand %p3440_p11, %p3436_p3 }
  0x84   : > { %3444 = shalt.err (!%p3441_p13)
}
  0x85   : > { %s3445_s30 = scalar_lea.vmem %s300_s11, 2048  ;;  %s3544_s20 = smov [#allocation11]  }
  0x86   : > { %p3446_p0 = scmp.ne.s32.totalorder %s300_s11, %s3445_s30  ;;  %s3450_s2 = sshll.u32 %s3544_s20, 4  ;;  %s3451_s2 = int_to_ptr.vmem [resolvable:$false] %s3450_s2 }
  0x87   : > { %s3452_s27 = scalar_lea.vmem %s3451_s2, 4096  ;;  %p3453_p8 = scmp.lt.s32.totalorder %s300_s11, %s3451_s2 }
  0x88   : > { %p3448_p6 = pnand %p3446_p0, %p3647_p7  ;;  %p3454_p2 = scmp.lt.s32.totalorder %s3452_s27, %s3445_s30 }
  0x8a   : > { %p3449_p4 = pneg %p3448_p6  ;;  %p3455_p12 = por %p3454_p2, %p3453_p8 }
  0x8c   : > { %p3456_p1 = pnand %p3455_p12, %p3449_p4 }
  0x8e   : > { %3459 = shalt.err (!%p3456_p1)
}
  0x8f   : > { %3008 = dma.hbm_to_vmem [thread:$0]  (!%p3627_p5), %s3776_s29, 2048, %s300_s11, %s3681_s10, %s3542_s4, %s3542_s4, %s3543_s23  }
  0x90   : > { %p4295_p7 = scmp.ne.s32.totalorder %s4293_s13, 0 }
  0x91   : > { %p4296_p3 = scmp.eq.s32.totalorder (!%p4295_p7), %s3705_s12, 0 }
  0x92   : > { %311 = sbr.rel (%p4295_p7) target bundleno = 2577 (0xa11), region = 44 }
  0x97   : > { %3501 = dma.done.wait (%p4296_p3), [#allocation4], 512   ;;  %p4297_p9 = pmov %p4296_p3 }
  0x98   : > { %s317_s17 = sand.u32 1, %s3705_s12   ;;  %s319_s8 = sand.u32 1, %s3522_s22  }
  0x99   : > { %3503 = vsyncadd (%p4297_p9), [#allocation4], 4294966784  ;;  %s2975_s28 = smul.u32 192, %s319_s8  ;;  %s318_s21 = scalar_lea.sflag [#allocation7], %s317_s17 }
  0x9a   : > { %p4298_p10 = scmp.ne.s32.totalorder %s4292_s14, 0 }
  0x9b   : > { %s3808_s19 = scalar_lea.vmem [#allocation6], %s2975_s28 }
  0x9c   : > { %3505 = dma.done.wait (%p4298_p10), %s318_s21, 4096  }
  0x9d   : > { %3507 = vsyncadd (%p4298_p10), %s318_s21, 4294963200  ;;  %s2640_s10 = sshll.u32 %s319_s8, 6  ;;  %s2641_s13 = sshll.u32 %s319_s8, 8 }
  0x9e   : > { %s3814_s4 = scalar_lea.vmem [#allocation8], %s2640_s10  ;;  %s336_s23 = scalar_lea.sflag [#allocation10], %s317_s17 }
  0x9f   : > { %s3816_s29 = scalar_lea.vmem [#allocation9], %s2641_s13 }
  0xa0   : > { %3509 = dma.done.wait (%p4298_p10), %s336_s23, 6144  }
  0xa1   : > { %3511 = vsyncadd (%p4298_p10), %s336_s23, 4294961152  ;;  %s2642_s26 = sshll.u32 %s319_s8, 7  ;;  %p4299_p5 = scmp.ne.s32.totalorder %s3705_s12, 0 }
  0xa2   : > { %s3822_s11 = scalar_lea.vmem [#allocation11], %s2642_s26 }
  0xa3   : > { %391 = sbr.rel (%p4299_p5) target bundleno = 171 (0xab), region = 68 }
  0xa8   : > { %v392_v0 = vld [vmem:[#allocation3] sm:$0xff]  ;;  %v393_v1 = vld [vmem:[#allocation3 + $0x8] sm:$0xff]  ;;  %v394_v2 = vld [vmem:[#allocation3 + $0x10] sm:$0xff] }
  0xa9   : > { %396 = vst [vmem:[#allocation2 + $0x10] sm:$0xff] %v392_v0  ;;  %397 = vst [vmem:[#allocation2] sm:$0xff] %v393_v1  ;;  %v395_v3 = vld [vmem:[#allocation3 + $0x18] sm:$0xff] }
  0xaa   : > { %398 = vst [vmem:[#allocation2 + $0x18] sm:$0xff] %v394_v2  ;;  %399 = vst [vmem:[#allocation2 + $0x8] sm:$0xff] %v395_v3 }
  0xab PF: > { %v3094_v10 = vld [vmem:[%s3808_s19 + $0xac] ss:$12 sps:$4 sm:$0xff]   ;;  %v3096_v11 = vld [vmem:[%s3808_s19 + $0xa8] ss:$12 sps:$4 sm:$0xff]   ;;  %v3099_v15 = vld [vmem:[%s3808_s19 + $0x90] ss:$12 sps:$4 sm:$0xff]  }
  0xac   : > { %v3097_v14 = vld [vmem:[%s3808_s19 + $0x94] ss:$12 sps:$4 sm:$0xff]   ;;  %595 = vmatprep.subr.bf16.mxu0 %v3094_v10  ;;  %v3100_v16 = vld [vmem:[%s3808_s19 + $0x7c] ss:$12 sps:$4 sm:$0xff]   ;;  %v3102_v17 = vld [vmem:[%s3808_s19 + $0x78] ss:$12 sps:$4 sm:$0xff]  }
  0xad   : > { %596 = vmatpush1.bf16.msra.mxu0 %v3096_v11  ;;  %v3103_v18 = vld [vmem:[%s3808_s19 + $0x64] ss:$12 sps:$4 sm:$0xff]   ;;  %v3105_v19 = vld [vmem:[%s3808_s19 + $0x60] ss:$12 sps:$4 sm:$0xff]   ;;  %v3108_v21 = vld [vmem:[%s3808_s19 + $0x48] ss:$12 sps:$4 sm:$0xff]  }
  0xae   : > { %597 = vmatprep.subr.bf16.mxu0 %v3097_v14  ;;  %v3106_v20 = vld [vmem:[%s3808_s19 + $0x4c] ss:$12 sps:$4 sm:$0xff]   ;;  %v3109_v22 = vld [vmem:[%s3808_s19 + $0x34] ss:$12 sps:$4 sm:$0xff]   ;;  %v3111_v23 = vld [vmem:[%s3808_s19 + $0x30] ss:$12 sps:$4 sm:$0xff]  }
  0xaf   : > { %v3112_v24 = vld [vmem:[%s3808_s19 + $0x1c] ss:$12 sps:$4 sm:$0xff]   ;;  %v3545_v25 = vmov 0   ;;  %v3114_v26 = vld [vmem:[%s3808_s19 + $0x18] ss:$12 sps:$4 sm:$0xff]   ;;  %v3546_v59 = vmov 0.0  }
  0xb0   : > { %v3826_v4 = vld [vmem:[#allocation2 + $0x10] sm:$0xff]  ;;  %v3828_v5 = vld [vmem:[#allocation2] sm:$0xff]  ;;  %627 = vmatprep.mubr.bf16.mxu0 %v3545_v25  ;;  %vm3547_vm0 = vmmov 0   ;;  %vm700_vm1 = vcmask 261120   ;;  %s3548_s14 = smov 96   ;;  %s3549_s9 = smov 64  }
  0xb1   : > { %v3830_v6 = vld [vmem:[#allocation2 + $0x18] sm:$0xff]  ;;  %v404_v7 = vmul.f32 %v3826_v4, %v3826_v4  ;;  %v3836_v9 = vld [vmem:[#allocation2 + $0x8] sm:$0xff]  ;;  %v405_v12 = vmul.f32 %v3828_v5, %v3828_v5  ;;  %598 = vmatpush1.bf16.msra.mxu0 %v3099_v15  ;;  %v3115_v27 = vld [vmem:[%s3808_s19 + $0x4] ss:$12 sps:$4 sm:$0xff]   ;;  %s3550_s16 = smov 32   ;;  %vm750_vm2 = vcmask 130048  }
  0xb2   : > { %v406_v8 = vmul.f32 %v3830_v6, %v3830_v6  ;;  %v407_v13 = vmul.f32 %v3836_v9, %v3836_v9  ;;  %599 = vmatprep.subr.bf16.mxu0 %v3100_v16  ;;  %v3117_v28 = vld [vmem:[%s3808_s19] ss:$12 sps:$4 sm:$0xff]   ;;  %v3118_v29 = vld [vmem:[%s3808_s19 + $0xb0] ss:$12 sps:$4 sm:$0xff]   ;;  %v3119_v30 = vld [vmem:[%s3808_s19 + $0x98] ss:$12 sps:$4 sm:$0xff]  }
  0xb3   : > { %408 = vadd.xlane.f32.xlu0 %v404_v7  ;;  %2837 = vmatprep.subr.bf16.mxu1 %v3118_v29  ;;  %v3120_v31 = vld [vmem:[%s3808_s19 + $0x80] ss:$12 sps:$4 sm:$0xff]   ;;  %v3121_v32 = vld [vmem:[%s3808_s19 + $0x68] ss:$12 sps:$4 sm:$0xff]   ;;  %v3122_v33 = vld [vmem:[%s3808_s19 + $0x50] ss:$12 sps:$4 sm:$0xff]  }
  0xb4   : > { %412 = vadd.xlane.f32.xlu1 %v406_v8  ;;  %2838 = vmatpush3.bf16.msra.mxu1 %v3118_v29  ;;  %v3123_v34 = vld [vmem:[%s3808_s19 + $0x38] ss:$12 sps:$4 sm:$0xff]   ;;  %v3124_v35 = vld [vmem:[%s3808_s19 + $0x20] ss:$12 sps:$4 sm:$0xff]   ;;  %v3125_v36 = vld [vmem:[%s3808_s19 + $0x8] ss:$12 sps:$4 sm:$0xff]  }
  0xb5   : > { %600 = vmatpush1.bf16.msra.mxu0 %v3102_v17  ;;  %2839 = vmatprep.subr.bf16.mxu1 %v3119_v30  ;;  %vm1216_vm3 = vcmask 523264   ;;  %vm1219_vm4 = vcmask 785408   ;;  %p2748_p11 = scmp.ne.s32.totalorder %s3705_s12, 1 }
  0xb6   : > { %601 = vmatprep.subr.bf16.mxu0 %v3103_v18 }
  0xb7   : > { %410 = vadd.xlane.f32.xlu0 %v405_v12 }
  0xb8   : > { %414 = vadd.xlane.f32.xlu1 %v407_v13  ;;  %2840 = vmatpush3.bf16.msra.mxu1 %v3119_v30 }
  0xb9   : > { %602 = vmatpush1.bf16.msra.mxu0 %v3105_v19  ;;  %2841 = vmatprep.subr.bf16.mxu1 %v3120_v31 }
  0xba   : > { %603 = vmatprep.subr.bf16.mxu0 %v3106_v20 }
  0xbc   : > { %2842 = vmatpush3.bf16.msra.mxu1 %v3120_v31 }
  0xbd   : > { %604 = vmatpush1.bf16.msra.mxu0 %v3108_v21  ;;  %2843 = vmatprep.subr.bf16.mxu1 %v3121_v32 }
  0xbe   : > { %605 = vmatprep.subr.bf16.mxu0 %v3109_v22 }
  0xc0   : > { %2844 = vmatpush3.bf16.msra.mxu1 %v3121_v32 }
  0xc1   : > { %606 = vmatpush1.bf16.msra.mxu0 %v3111_v23  ;;  %2845 = vmatprep.subr.bf16.mxu1 %v3122_v33 }
  0xc2   : > { %607 = vmatprep.subr.bf16.mxu0 %v3112_v24 }
  0xc4   : > { %2846 = vmatpush3.bf16.msra.mxu1 %v3122_v33 }
  0xc5   : > { %608 = vmatpush1.bf16.msra.mxu0 %v3114_v26  ;;  %2847 = vmatprep.subr.bf16.mxu1 %v3123_v34 }
  0xc6   : > { %609 = vmatprep.subr.bf16.mxu0 %v3115_v27 }
  0xc8   : > { %2848 = vmatpush3.bf16.msra.mxu1 %v3123_v34 }
  0xc9   : > { %610 = vmatpush1.bf16.msra.mxu0 %v3117_v28  ;;  %2849 = vmatprep.subr.bf16.mxu1 %v3124_v35 }
  0xca   : > { %2863 = vmatprep.subr.bf16.mxu0 %v3546_v59 }
  0xcc   : > { %2850 = vmatpush3.bf16.msra.mxu1 %v3124_v35 }
  0xcd   : > { %2851 = vmatprep.subr.bf16.mxu1 %v3125_v36 }
  0xd0   : > { %2852 = vmatpush3.bf16.msra.mxu1 %v3125_v36 }
  0xd1   : > { %2857 = vmatprep.subr.bf16.mxu1 %v3546_v59 }
 0x13c   : > { %v409_v37 = vpop.xlane.xlu0 %408 }
 0x13d   : > { %v413_v38 = vpop.xlane.xlu1 %412  ;;  %v417_v39 = vmul.f32 0.0078125, %v409_v37 }
 0x13e   : > { %v419_v40 = vmul.f32 0.0078125, %v413_v38 }
 0x13f   : > { %v421_v41 = vadd.f32 1e-06, %v417_v39 }
 0x140   : > { %v423_v42 = vadd.f32 1e-06, %v419_v40  ;;  %v411_v43 = vpop.xlane.xlu0 %410 }
 0x141   : > { %v415_v44 = vpop.xlane.xlu1 %414  ;;  %v418_v45 = vmul.f32 0.0078125, %v411_v43 }
 0x142   : > { %v420_v46 = vmul.f32 0.0078125, %v415_v44  ;;  %3198 = vrsqrt.f32 %v423_v42 }
 0x143   : > { %3200 = vrsqrt.f32 %v421_v41  ;;  %v422_v47 = vadd.f32 1e-06, %v418_v45 }
 0x144   : > { %v424_v48 = vadd.f32 1e-06, %v420_v46 }
 0x145   : > { %3202 = vrsqrt.f32 %v422_v47 }
 0x146   : > { %3204 = vrsqrt.f32 %v424_v48 }
 0x14f   : > { %v3199_v49 = vpop.eup %3198 }
 0x150   : > { %v3201_v50 = vpop.eup %3200  ;;  %v431_v52 = vmul.f32 %v3199_v49, %v3830_v6 }
 0x151   : > { %v429_v54 = vmul.f32 %v3201_v50, %v3826_v4 }
 0x152   : > { %v3203_v51 = vpop.eup %3202 }
 0x153   : > { %v3205_v53 = vpop.eup %3204  ;;  %v430_v55 = vmul.f32 %v3203_v51, %v3828_v5 }
 0x154   : > { %v432_v56 = vmul.f32 %v3205_v53, %v3836_v9 }
 0x155   : > { %v433_v57 = vpack.c.bf16 %v430_v55, %v429_v54 }
 0x156   : > { %v434_v58 = vpack.c.bf16 %v432_v56, %v431_v52 }
 0x157   : > { %628 = vmatmul.mubr.bf16.vlgmr.msra.gmra.mxu0 %v433_v57  ;;  %2853 = vmatprep.mubr.bf16.mxu1 %v433_v57 }
 0x158   : > { %637 = vmatprep.mubr.bf16.mxu0 %v3545_v25  ;;  %2854 = vmatmul.mubr.bf16.vlgmr.msra.gmra.mxu1 %v434_v58 }
 0x159   : > { %2859 = vmatprep.mubr.msk.bf16.mxu1 %vm3547_vm0, %v3546_v59 }
 0x15f   : > { %638 = vmatmul.mubr.bf16.gmra.mxu0 %v434_v58 }
 0x160   : > { %2865 = vmatprep.mubr.msk.bf16.mxu0 %vm3547_vm0, %v3546_v59 }
 0x217   : > { %v629_v60 = vpop.f32.mrf.mxu0 }
 0x218   : > { %v2855_v61 = vpop.f32.mrf.mxu1 }
 0x219   : > { %v631_v62 = vpop.f32.mrf.mxu0 }
 0x21a   : > { %v682_v63 = vpop.f32.mrf.mxu1 }
 0x21b   : > { %v633_v0 = vpop.f32.mrf.mxu0 }
 0x21c   : > { %v697_v1 = vpack.c.bf16 %v633_v0, %v629_v60  ;;  %v2856_v2 = vpop.f32.mrf.mxu1 }
 0x21d   : > { %v635_v3 = vpop.f32.mrf.mxu0  ;;  %v3878_v4 = vpack.c.bf16 %v2856_v2, %v2855_v61 }
 0x21e   : > { %v698_v5 = vpack.c.bf16 %v635_v3, %v631_v62  ;;  %819 = vrot.lane.b32.xlu1 %v697_v1, %s3548_s14  ;;  %v685_v6 = vpop.f32.mrf.mxu1 }
 0x21f   : > { %v639_v7 = vpop.f32.mrf.mxu0  ;;  %v3881_v8 = vpack.c.bf16 %v685_v6, %v682_v63 }
 0x220   : > { %822 = vrot.lane.b32.xlu0 %v698_v5, %s3548_s14  ;;  %v705_v9 = vsel %vm700_vm1, %v698_v5, 0 }
 0x221   : > { %2858 = vmatpush3.bf16.xpose.msra.mxu1 %v705_v9  ;;  %v641_v10 = vpop.f32.mrf.mxu0  ;;  %2864 = vmatpush3.bf16.msra.mxu0 %v3881_v8 }
 0x222   : > { %946 = vrot.lane.b32.xlu1 %v698_v5, %s3549_s9  ;;  %2869 = vmatprep.subr.bf16.mxu1 %v3546_v59 }
 0x223   : > { %v643_v11 = vpop.f32.mrf.mxu0  ;;  %2875 = vmatprep.subr.bf16.mxu0 %v3546_v59 }
 0x224   : > { %1069 = vrot.lane.b32.xlu0 %v698_v5, %s3550_s16  ;;  %v1222_v14 = vpack.c.bf16 %v643_v11, %v639_v7 }
 0x225   : > { %v645_v12 = vpop.f32.mrf.mxu0 }
 0x226   : > { %944 = vrot.lane.b32.xlu1 %v697_v1, %s3549_s9  ;;  %v1223_v13 = vpack.c.bf16 %v645_v12, %v641_v10 }
 0x228   : > { %2860 = vmatmul.mubr.msk.bf16.vlgmr.msra.gmra.mxu1 %vm700_vm1, %v697_v1  ;;  %1345 = vrot.lane.b32.xlu0 %v1223_v13, %s3548_s14  ;;  %v1229_v24 = vsel %vm700_vm1, %v1223_v13, 0 }
 0x229   : > { %2871 = vmatprep.mubr.msk.bf16.mxu1 %vm3547_vm0, %v3546_v59 }
 0x22a   : > { %1067 = vrot.lane.b32.xlu1 %v697_v1, %s3550_s16 }
 0x22c   : > { %1469 = vrot.lane.b32.xlu0 %v1223_v13, %s3549_s9 }
 0x22e   : > { %1342 = vrot.lane.b32.xlu1 %v1222_v14, %s3548_s14 }
 0x230   : > { %1592 = vrot.lane.b32.xlu0 %v1223_v13, %s3550_s16 }
 0x232   : > { %1467 = vrot.lane.b32.xlu1 %v1222_v14, %s3549_s9 }
 0x236   : > { %1590 = vrot.lane.b32.xlu1 %v1222_v14, %s3550_s16 }
 0x290   : > { %v820_v15 = vpop.permute.xlu1 %819 }
 0x292   : > { %v823_v16 = vpop.permute.xlu0 %822 }
 0x293   : > { %v828_v17 = vsel %vm700_vm1, %v823_v16, 0 }
 0x294   : > { %2870 = vmatpush3.bf16.xpose.msra.mxu1 %v828_v17  ;;  %v947_v18 = vpop.permute.xlu1 %946 }
 0x295   : > { %2881 = vmatprep.subr.bf16.mxu1 %v3546_v59  ;;  %v952_v19 = vsel %vm700_vm1, %v947_v18, 0 }
 0x296   : > { %v1070_v20 = vpop.permute.xlu0 %1069 }
 0x297   : > { %v1075_v22 = vsel %vm700_vm1, %v1070_v20, 0 }
 0x298   : > { %v945_v21 = vpop.permute.xlu1 %944 }
 0x29a   : > { %v1346_v26 = vpop.permute.xlu0 %1345 }
 0x29b   : > { %2872 = vmatmul.mubr.msk.bf16.vlgmr.msra.gmra.mxu1 %vm700_vm1, %v820_v15  ;;  %v1351_v27 = vsel %vm700_vm1, %v1346_v26, 0 }
 0x29c   : > { %2882 = vmatpush3.bf16.xpose.msra.mxu1 %v952_v19  ;;  %2883 = vmatprep.mubr.msk.bf16.mxu1 %vm3547_vm0, %v3546_v59  ;;  %v1068_v23 = vpop.permute.xlu1 %1067 }
 0x29d   : > { %2893 = vmatprep.subr.bf16.mxu1 %v3546_v59 }
 0x29e   : > { %v1470_v28 = vpop.permute.xlu0 %1469 }
 0x29f   : > { %v1475_v30 = vsel %vm700_vm1, %v1470_v28, 0 }
 0x2a0   : > { %v1343_v29 = vpop.permute.xlu1 %1342 }
 0x2a2   : > { %v1593_v31 = vpop.permute.xlu0 %1592 }
 0x2a3   : > { %2884 = vmatmul.mubr.msk.bf16.vlgmr.msra.gmra.mxu1 %vm700_vm1, %v945_v21  ;;  %v1598_v32 = vsel %vm700_vm1, %v1593_v31, 0 }
 0x2a4   : > { %2894 = vmatpush3.bf16.xpose.msra.mxu1 %v1075_v22  ;;  %2895 = vmatprep.mubr.msk.bf16.mxu1 %vm3547_vm0, %v3546_v59  ;;  %v1468_v33 = vpop.permute.xlu1 %1467 }
 0x2a5   : > { %2905 = vmatprep.subr.bf16.mxu1 %v3546_v59 }
 0x2a8   : > { %v1591_v34 = vpop.permute.xlu1 %1590 }
 0x2ab   : > { %2896 = vmatmul.mubr.msk.bf16.vlgmr.msra.gmra.mxu1 %vm700_vm1, %v1068_v23 }
 0x2ac   : > { %2906 = vmatpush3.bf16.xpose.msra.mxu1 %v1229_v24  ;;  %2907 = vmatprep.mubr.msk.bf16.mxu1 %vm3547_vm0, %v3546_v59 }
 0x2ad   : > { %2917 = vmatprep.subr.bf16.mxu1 %v3546_v59 }
 0x2b3   : > { %2908 = vmatmul.mubr.msk.bf16.vlgmr.msra.gmra.mxu1 %vm700_vm1, %v1222_v14 }
 0x2b4   : > { %2918 = vmatpush3.bf16.xpose.msra.mxu1 %v1351_v27  ;;  %2919 = vmatprep.mubr.msk.bf16.mxu1 %vm3547_vm0, %v3546_v59 }
 0x2b5   : > { %2929 = vmatprep.subr.bf16.mxu1 %v3546_v59 }
 0x2bb   : > { %2920 = vmatmul.mubr.msk.bf16.vlgmr.msra.gmra.mxu1 %vm700_vm1, %v1343_v29 }
 0x2bc   : > { %2930 = vmatpush3.bf16.xpose.msra.mxu1 %v1475_v30  ;;  %2931 = vmatprep.mubr.msk.bf16.mxu1 %vm3547_vm0, %v3546_v59 }
 0x2bd   : > { %2941 = vmatprep.subr.bf16.mxu1 %v3546_v59 }
 0x2c3   : > { %2932 = vmatmul.mubr.msk.bf16.vlgmr.msra.gmra.mxu1 %vm700_vm1, %v1468_v33 }
 0x2c4   : > { %2942 = vmatpush3.bf16.xpose.msra.mxu1 %v1598_v32  ;;  %2943 = vmatprep.mubr.msk.bf16.mxu1 %vm3547_vm0, %v3546_v59 }
 0x2cb   : > { %2944 = vmatmul.mubr.msk.bf16.vlgmr.msra.gmra.mxu1 %vm700_vm1, %v1591_v34 }
 0x2e8   : > { %v741_v35 = vpop.f32.mrf.mxu1 }
 0x2e9   : > { %v748_v36 = vmul.f32 0.17677669, %v741_v35 }
 0x2ea   : > { %v2861_v37 = vpop.f32.mrf.mxu1 }
 0x2eb   : > { %v751_v38 = vsel %vm750_vm2, %v748_v36, -inf }
 0x2ec   : > { %v744_v39 = vpop.f32.mrf.mxu1  ;;  %752 = vmax.xlane.f32.xlu0 %v751_v38 }
 0x2ed   : > { %v749_v40 = vmul.f32 0.17677669, %v744_v39 }
 0x2ee   : > { %v2862_v41 = vpop.f32.mrf.mxu1 }
 0x2ef   : > { %v754_v42 = vsel %vm750_vm2, %v749_v40, -inf }
 0x2f0   : > { %755 = vmax.xlane.f32.xlu1 %v754_v42 }
 0x35b   : > { %v864_v43 = vpop.f32.mrf.mxu1 }
 0x35c   : > { %v3935_v44 = vmul.f32 0.17677669, %v864_v43 }
 0x35d   : > { %v2873_v45 = vpop.f32.mrf.mxu1 }
 0x35e   : > { %v873_v46 = vsel %vm750_vm2, %v3935_v44, -inf }
 0x35f   : > { %v867_v47 = vpop.f32.mrf.mxu1  ;;  %874 = vmax.xlane.f32.xlu0 %v873_v46 }
 0x360   : > { %v3939_v48 = vmul.f32 0.17677669, %v867_v47 }
 0x361   : > { %v2874_v49 = vpop.f32.mrf.mxu1 }
 0x362   : > { %v876_v50 = vsel %vm750_vm2, %v3939_v48, -inf }
 0x363   : > { %v988_v51 = vpop.f32.mrf.mxu1  ;;  %877 = vmax.xlane.f32.xlu0 %v876_v50 }
 0x364   : > { %v3943_v52 = vmul.f32 0.17677669, %v988_v51 }
 0x365   : > { %v2885_v53 = vpop.f32.mrf.mxu1 }
 0x366   : > { %v997_v54 = vsel %vm750_vm2, %v3943_v52, -inf }
 0x367   : > { %v991_v55 = vpop.f32.mrf.mxu1  ;;  %998 = vmax.xlane.f32.xlu0 %v997_v54 }
 0x368   : > { %v3947_v56 = vmul.f32 0.17677669, %v991_v55 }
 0x369   : > { %v2886_v57 = vpop.f32.mrf.mxu1 }
 0x36a   : > { %v1000_v58 = vsel %vm750_vm2, %v3947_v56, -inf }
 0x36b   : > { %v1111_v60 = vpop.f32.mrf.mxu1  ;;  %1001 = vmax.xlane.f32.xlu1 %v1000_v58 }
 0x36c   : > { %v3951_v61 = vmul.f32 0.17677669, %v1111_v60 }
 0x36d   : > { %v2897_v62 = vpop.f32.mrf.mxu1 }
 0x36e   : > { %v1120_v63 = vsel %vm750_vm2, %v3951_v61, -inf }
 0x36f   : > { %v1114_v0 = vpop.f32.mrf.mxu1  ;;  %1121 = vmax.xlane.f32.xlu0 %v1120_v63 }
 0x370   : > { %v3955_v1 = vmul.f32 0.17677669, %v1114_v0 }
 0x371   : > { %v2898_v2 = vpop.f32.mrf.mxu1 }
 0x372   : > { %v1123_v3 = vsel %vm750_vm2, %v3955_v1, -inf }
 0x373   : > { %1124 = vmax.xlane.f32.xlu1 %v1123_v3  ;;  %v1265_v5 = vpop.f32.mrf.mxu1 }
 0x374   : > { %v3959_v6 = vmul.f32 0.17677669, %v1265_v5 }
 0x375   : > { %v753_v7 = vpop.xlane.xlu0 %752  ;;  %v2909_v9 = vpop.f32.mrf.mxu1 }
 0x376   : > { %v757_v10 = vsub.f32 %v748_v36, %v753_v7  ;;  %v1274_v11 = vsel %vm750_vm2, %v3959_v6, -inf }
 0x377   : > { %1275 = vmax.xlane.f32.xlu0 %v1274_v11  ;;  %v1268_v12 = vpop.f32.mrf.mxu1 }
 0x378   : > { %v759_v13 = vmul.f32 1.442695, %v757_v10  ;;  %v3963_v14 = vmul.f32 0.17677669, %v1268_v12 }
 0x379   : > { %v756_v15 = vpop.xlane.xlu1 %755  ;;  %v2910_v16 = vpop.f32.mrf.mxu1 }
 0x37a   : > { %3206 = vpow2.f32 %v759_v13  ;;  %v758_v17 = vsub.f32 %v749_v40, %v756_v15  ;;  %v1277_v18 = vsel %vm750_vm2, %v3963_v14, -inf }
 0x37b   : > { %1278 = vmax.xlane.f32.xlu1 %v1277_v18  ;;  %v1387_v19 = vpop.f32.mrf.mxu1 }
 0x37c   : > { %v761_v20 = vmul.f32 1.442695, %v758_v17  ;;  %v3967_v21 = vmul.f32 0.17677669, %v1387_v19 }
 0x37d   : > { %v2921_v22 = vpop.f32.mrf.mxu1 }
 0x37e   : > { %3208 = vpow2.f32 %v761_v20  ;;  %v1396_v23 = vsel %vm750_vm2, %v3967_v21, -inf }
 0x37f   : > { %1397 = vmax.xlane.f32.xlu0 %v1396_v23  ;;  %v1390_v24 = vpop.f32.mrf.mxu1 }
 0x380   : > { %v3971_v26 = vmul.f32 0.17677669, %v1390_v24 }
 0x381   : > { %v2922_v27 = vpop.f32.mrf.mxu1 }
 0x382   : > { %v1399_v28 = vsel %vm750_vm2, %v3971_v26, -inf }
 0x383   : > { %1400 = vmax.xlane.f32.xlu1 %v1399_v28  ;;  %v1511_v29 = vpop.f32.mrf.mxu1 }
 0x384   : > { %v3975_v30 = vmul.f32 0.17677669, %v1511_v29 }
 0x385   : > { %v2933_v31 = vpop.f32.mrf.mxu1 }
 0x386   : > { %v1520_v32 = vsel %vm750_vm2, %v3975_v30, -inf }
 0x387   : > { %v3979_v33 = vpop.eup %3206  ;;  %1521 = vmax.xlane.f32.xlu0 %v1520_v32  ;;  %v1514_v34 = vpop.f32.mrf.mxu1 }
 0x388   : > { %v3981_v35 = vmul.f32 0.17677669, %v1514_v34  ;;  %v763_v37 = vsel %vm750_vm2, %v3979_v33, 0.0 }
 0x389   : > { %v2934_v36 = vpop.f32.mrf.mxu1 }
 0x38a   : > { %v1523_v38 = vsel %vm750_vm2, %v3981_v35, -inf }
 0x38b   : > { %v3987_v39 = vpop.eup %3208  ;;  %764 = vadd.xlane.f32.xlu0 %v763_v37  ;;  %1524 = vmax.xlane.f32.xlu1 %v1523_v38  ;;  %v1634_v40 = vpop.f32.mrf.mxu1 }
 0x38c   : > { %v3989_v41 = vmul.f32 0.17677669, %v1634_v40  ;;  %v766_v43 = vsel %vm750_vm2, %v3987_v39, 0.0 }
 0x38d   : > { %v2945_v42 = vpop.f32.mrf.mxu1 }
 0x38e   : > { %v1643_v45 = vsel %vm750_vm2, %v3989_v41, -inf }
 0x38f   : > { %767 = vadd.xlane.f32.xlu1 %v766_v43  ;;  %1644 = vmax.xlane.f32.xlu0 %v1643_v45  ;;  %v1637_v46 = vpop.f32.mrf.mxu1 }
 0x390   : > { %v3995_v47 = vmul.f32 0.17677669, %v1637_v46 }
 0x391   : > { %v2946_v49 = vpop.f32.mrf.mxu1 }
 0x392   : > { %v1646_v50 = vsel %vm750_vm2, %v3995_v47, -inf }
 0x393   : > { %1647 = vmax.xlane.f32.xlu1 %v1646_v50 }
 0x3a4   : > { %1020 = vrot.lane.b32.xlu1 %v3881_v8, %s3549_s9 }
 0x3a5   : > { %897 = vrot.lane.b32.xlu0 %v3881_v8, %s3548_s14 }
 0x3e8   : > { %v875_v51 = vpop.xlane.xlu0 %874 }
 0x3e9   : > { %v879_v53 = vsub.f32 %v3935_v44, %v875_v51 }
 0x3eb   : > { %v881_v54 = vmul.f32 1.442695, %v879_v53 }
 0x3ec   : > { %v878_v55 = vpop.xlane.xlu0 %877 }
 0x3ed   : > { %3210 = vpow2.f32 %v881_v54  ;;  %v880_v57 = vsub.f32 %v3939_v48, %v878_v55 }
 0x3ef   : > { %v883_v58 = vmul.f32 1.442695, %v880_v57 }
 0x3f0   : > { %v999_v60 = vpop.xlane.xlu0 %998 }
 0x3f1   : > { %3212 = vpow2.f32 %v883_v58  ;;  %v1003_v62 = vsub.f32 %v3943_v52, %v999_v60 }
 0x3f3   : > { %v1005_v63 = vmul.f32 1.442695, %v1003_v62 }
 0x3f4   : > { %v1002_v0 = vpop.xlane.xlu1 %1001 }
 0x3f5   : > { %3214 = vpow2.f32 %v1005_v63  ;;  %v1004_v2 = vsub.f32 %v3947_v56, %v1002_v0 }
 0x3f7   : > { %v1007_v3 = vmul.f32 1.442695, %v1004_v2 }
 0x3f8   : > { %v1122_v5 = vpop.xlane.xlu0 %1121 }
 0x3f9   : > { %3216 = vpow2.f32 %v1007_v3  ;;  %v1126_v44 = vsub.f32 %v3951_v61, %v1122_v5 }
 0x3fa   : > { %v4008_v7 = vpop.eup %3210 }
 0x3fb   : > { %v1128_v9 = vmul.f32 1.442695, %v1126_v44  ;;  %v885_v48 = vsel %vm750_vm2, %v4008_v7, 0.0 }
 0x3fc   : > { %v1125_v10 = vpop.xlane.xlu1 %1124  ;;  %886 = vadd.xlane.f32.xlu0 %v885_v48 }
 0x3fd   : > { %3218 = vpow2.f32 %v1128_v9  ;;  %v1127_v52 = vsub.f32 %v3955_v1, %v1125_v10 }
 0x3fe   : > { %v4013_v11 = vpop.eup %3212 }
 0x3ff   : > { %v1130_v12 = vmul.f32 1.442695, %v1127_v52  ;;  %v888_v56 = vsel %vm750_vm2, %v4013_v11, 0.0 }
 0x400   : > { %v1276_v13 = vpop.xlane.xlu0 %1275  ;;  %889 = vadd.xlane.f32.xlu1 %v888_v56 }
 0x401   : > { %3220 = vpow2.f32 %v1130_v12  ;;  %v1280_v61 = vsub.f32 %v3959_v6, %v1276_v13 }
 0x402   : > { %v4018_v15 = vpop.eup %3214 }
 0x403   : > { %v1282_v16 = vmul.f32 1.442695, %v1280_v61  ;;  %v1009_v17 = vsel %vm750_vm2, %v4018_v15, 0.0 }
 0x404   : > { %v1279_v18 = vpop.xlane.xlu1 %1278  ;;  %1010 = vadd.xlane.f32.xlu0 %v1009_v17 }
 0x405   : > { %3222 = vpow2.f32 %v1282_v16  ;;  %v1281_v1 = vsub.f32 %v3963_v14, %v1279_v18 }
 0x406   : > { %v4023_v19 = vpop.eup %3216 }
 0x407   : > { %v1284_v20 = vmul.f32 1.442695, %v1281_v1  ;;  %v1012_v22 = vsel %vm750_vm2, %v4023_v19, 0.0 }
 0x408   : > { %v1398_v23 = vpop.xlane.xlu0 %1397  ;;  %1013 = vadd.xlane.f32.xlu1 %v1012_v22 }
 0x409   : > { %3224 = vpow2.f32 %v1284_v20  ;;  %v1402_v6 = vsub.f32 %v3967_v21, %v1398_v23 }
 0x40a   : > { %v4028_v24 = vpop.eup %3218 }
 0x40b   : > { %v1404_v27 = vmul.f32 1.442695, %v1402_v6  ;;  %v1132_v28 = vsel %vm750_vm2, %v4028_v24, 0.0 }
 0x40c   : > { %v1401_v29 = vpop.xlane.xlu1 %1400  ;;  %1133 = vadd.xlane.f32.xlu0 %v1132_v28 }
 0x40d   : > { %3226 = vpow2.f32 %v1404_v27  ;;  %v1403_v14 = vsub.f32 %v3971_v26, %v1401_v29 }
 0x40e   : > { %v4033_v31 = vpop.eup %3220 }
 0x40f   : > { %v1406_v32 = vmul.f32 1.442695, %v1403_v14  ;;  %v1135_v34 = vsel %vm750_vm2, %v4033_v31, 0.0 }
 0x410   : > { %v1522_v36 = vpop.xlane.xlu0 %1521  ;;  %1136 = vadd.xlane.f32.xlu1 %v1135_v34 }
 0x411   : > { %3228 = vpow2.f32 %v1406_v32 }
 0x412   : > { %v4037_v21 = vpop.eup %3222 }
 0x413   : > { %v1286_v37 = vsel %vm750_vm2, %v4037_v21, 0.0 }
 0x414   : > { %v765_v38 = vpop.xlane.xlu0 %764  ;;  %v1525_v40 = vpop.xlane.xlu1 %1524  ;;  %1287 = vadd.xlane.f32.xlu0 %v1286_v37 }
 0x415   : > { %v1527_v42 = vsub.f32 %v3981_v35, %v1525_v40  ;;  %3230 = vrcp.f32 %v765_v38 }
 0x416   : > { %v4042_v26 = vpop.eup %3224 }
 0x417   : > { %v1530_v43 = vmul.f32 1.442695, %v1527_v42  ;;  %v1289_v45 = vsel %vm750_vm2, %v4042_v26, 0.0 }
 0x418   : > { %v768_v46 = vpop.xlane.xlu1 %767  ;;  %v1645_v49 = vpop.xlane.xlu0 %1644  ;;  %1290 = vadd.xlane.f32.xlu1 %v1289_v45 }
 0x419   : > { %3232 = vpow2.f32 %v1530_v43  ;;  %v1649_v50 = vsub.f32 %v3989_v41, %v1645_v49 }
 0x41a   : > { %v4047_v51 = vpop.eup %3226  ;;  %3234 = vrcp.f32 %v768_v46 }
 0x41b   : > { %v1651_v53 = vmul.f32 1.442695, %v1649_v50  ;;  %v1408_v35 = vsel %vm750_vm2, %v4047_v51, 0.0 }
 0x41c   : > { %1409 = vadd.xlane.f32.xlu1 %v1408_v35  ;;  %v1648_v54 = vpop.xlane.xlu1 %1647  ;;  %v898_v9 = vpop.permute.xlu0 %897 }
 0x41d   : > { %3236 = vpow2.f32 %v1651_v53  ;;  %v1650_v55 = vsub.f32 %v3995_v47, %v1648_v54 }
 0x41e   : > { %v4052_v57 = vpop.eup %3228 }
 0x41f   : > { %v1653_v58 = vmul.f32 1.442695, %v1650_v55  ;;  %v1411_v60 = vsel %vm750_vm2, %v4052_v57, 0.0 }
 0x420   : > { %1412 = vadd.xlane.f32.xlu1 %v1411_v60  ;;  %v1021_v12 = vpop.permute.xlu1 %1020 }
 0x421   : > { %3238 = vpow2.f32 %v1653_v58 }
 0x422   : > { %v3231_v41 = vpop.eup %3230 }
 0x423   : > { %v771_v2 = vmul.f32 %v3231_v41, %v3979_v33 }
 0x426   : > { %v4056_v62 = vpop.eup %3232 }
 0x427   : > { %v3235_v63 = vpop.eup %3234  ;;  %v1535_v0 = vsel %vm750_vm2, %v4056_v62, 0.0 }
 0x428   : > { %v772_v3 = vmul.f32 %v3235_v63, %v3987_v39  ;;  %1536 = vadd.xlane.f32.xlu1 %v1535_v0 }
 0x42a   : > { %v4062_v47 = vpop.eup %3236  ;;  %v773_v5 = vpack.c.bf16 %v772_v3, %v771_v2  ;;  %1143 = vrot.lane.b32.xlu0 %v3881_v8, %s3550_s16  ;;  %v1526_v8 = vsub.f32 %v3975_v30, %v1522_v36 }
 0x42b   : > { %v1655_v44 = vsel %vm750_vm2, %v4062_v47, 0.0 }
 0x42c   : > { %2866 = vmatmul.mubr.msk.bf16.vlgmr.msra.gmra.mxu0 %vm750_vm2, %v773_v5  ;;  %1656 = vadd.xlane.f32.xlu1 %v1655_v44  ;;  %v1528_v48 = vmul.f32 1.442695, %v1526_v8 }
 0x42d   : > { %2876 = vmatpush3.bf16.msra.mxu0 %v898_v9  ;;  %2877 = vmatprep.mubr.msk.bf16.mxu0 %vm3547_vm0, %v3546_v59 }
 0x42e   : > { %v4071_v33 = vpop.eup %3238  ;;  %2887 = vmatprep.subr.bf16.mxu0 %v3546_v59  ;;  %3240 = vpow2.f32 %v1528_v48 }
 0x42f   : > { %v1658_v39 = vsel %vm750_vm2, %v4071_v33, 0.0 }
 0x430   : > { %1659 = vadd.xlane.f32.xlu1 %v1658_v39 }
 0x43b   : > { %v4079_v10 = vpop.eup %3240 }
 0x43c   : > { %v1532_v52 = vsel %vm750_vm2, %v4079_v10, 0.0 }
 0x441   : > { %1420 = vrot.lane.b32.xlu1 %v3878_v4, %s3548_s14 }
 0x449   : > { %1533 = vadd.xlane.f32.xlu0 %v1532_v52 }
 0x45f   : > { %1543 = vrot.lane.b32.xlu0 %v3878_v4, %s3549_s9 }
 0x463   : > { %1666 = vrot.lane.b32.xlu0 %v3878_v4, %s3550_s16 }
 0x485   : > { %v887_v30 = vpop.xlane.xlu0 %886 }
 0x486   : > { %3242 = vrcp.f32 %v887_v30 }
 0x489   : > { %v890_v56 = vpop.xlane.xlu1 %889 }
 0x48a   : > { %3244 = vrcp.f32 %v890_v56 }
 0x48d   : > { %v1011_v13 = vpop.xlane.xlu0 %1010 }
 0x48e   : > { %3246 = vrcp.f32 %v1011_v13 }
 0x491   : > { %v1014_v61 = vpop.xlane.xlu1 %1013 }
 0x492   : > { %3248 = vrcp.f32 %v1014_v61 }
 0x493   : > { %v3243_v16 = vpop.eup %3242 }
 0x494   : > { %v893_v1 = vmul.f32 %v3243_v16, %v4008_v7 }
 0x495   : > { %v1134_v17 = vpop.xlane.xlu0 %1133 }
 0x496   : > { %3250 = vrcp.f32 %v1134_v17 }
 0x497   : > { %v3245_v18 = vpop.eup %3244 }
 0x498   : > { %v894_v20 = vmul.f32 %v3245_v18, %v4013_v11 }
 0x499   : > { %v1137_v22 = vpop.xlane.xlu1 %1136 }
 0x49a   : > { %3252 = vrcp.f32 %v1137_v22  ;;  %v895_v23 = vpack.c.bf16 %v894_v20, %v893_v1 }
 0x49b   : > { %v3247_v6 = vpop.eup %3246 }
 0x49c   : > { %2878 = vmatmul.mubr.msk.bf16.vlgmr.msra.gmra.mxu0 %vm750_vm2, %v895_v23  ;;  %v1017_v29 = vmul.f32 %v3247_v6, %v4018_v15 }
 0x49d   : > { %2888 = vmatpush3.bf16.msra.mxu0 %v1021_v12  ;;  %v1288_v27 = vpop.xlane.xlu0 %1287  ;;  %2889 = vmatprep.mubr.msk.bf16.mxu0 %vm3547_vm0, %v3546_v59 }
 0x49e   : > { %2899 = vmatprep.subr.bf16.mxu0 %v3546_v59  ;;  %3254 = vrcp.f32 %v1288_v27 }
 0x49f   : > { %v3249_v28 = vpop.eup %3248 }
 0x4a0   : > { %v1018_v7 = vmul.f32 %v3249_v28, %v4023_v19  ;;  %v3126_v28 = vld [vmem:[%s3814_s4 + $0x38] sm:$0xff]  }
 0x4a1   : > { %v1291_v11 = vpop.xlane.xlu1 %1290  ;;  %v1144_v32 = vpop.permute.xlu0 %1143  ;;  %2953 = vmatprep.subr.bf16.mxu1 %v3126_v28 }
 0x4a2   : > { %3256 = vrcp.f32 %v1291_v11  ;;  %v1019_v14 = vpack.c.bf16 %v1018_v7, %v1017_v29  ;;  %v3127_v29 = vld [vmem:[%s3814_s4 + $0x30] sm:$0xff]   ;;  %2954 = vmatpush3.bf16.msra.mxu1 %v3126_v28  ;;  %v3128_v11 = vld [vmem:[%s3814_s4 + $0x28] sm:$0xff]  }
 0x4a3   : > { %v3251_v34 = vpop.eup %3250  ;;  %2955 = vmatprep.subr.bf16.mxu1 %v3127_v29 }
 0x4a4   : > { %2890 = vmatmul.mubr.msk.bf16.vlgmr.msra.gmra.mxu0 %vm750_vm2, %v1019_v14  ;;  %v1140_v38 = vmul.f32 %v3251_v34, %v4028_v24  ;;  %v3129_v34 = vld [vmem:[%s3814_s4 + $0x20] sm:$0xff]  }
 0x4a5   : > { %2900 = vmatpush3.bf16.msra.mxu0 %v1144_v32  ;;  %v1410_v36 = vpop.xlane.xlu1 %1409  ;;  %2901 = vmatprep.mubr.msk.bf16.mxu0 %vm3547_vm0, %v3546_v59 }
 0x4a6   : > { %2911 = vmatprep.subr.bf16.mxu0 %v3546_v59  ;;  %2956 = vmatpush3.bf16.msra.mxu1 %v3127_v29 }
 0x4a7   : > { %v3253_v37 = vpop.eup %3252  ;;  %2957 = vmatprep.subr.bf16.mxu1 %v3128_v11 }
 0x4a8   : > { %v1141_v15 = vmul.f32 %v3253_v37, %v4033_v31 }
 0x4a9   : > { %v1413_v19 = vpop.xlane.xlu1 %1412 }
 0x4aa   : > { %v1142_v40 = vpack.c.bf16 %v1141_v15, %v1140_v38  ;;  %3258 = vrcp.f32 %v1413_v19  ;;  %2958 = vmatpush3.bf16.msra.mxu1 %v3128_v11  ;;  %v3130_v38 = vld [vmem:[%s3814_s4 + $0x18] sm:$0xff]   ;;  %v3131_v15 = vld [vmem:[%s3814_s4 + $0x10] sm:$0xff]   ;;  %v3132_v19 = vld [vmem:[%s3814_s4 + $0x8] sm:$0xff]  }
 0x4ab   : > { %v3255_v42 = vpop.eup %3254  ;;  %3260 = vrcp.f32 %v1410_v36  ;;  %2959 = vmatprep.subr.bf16.mxu1 %v3129_v34 }
 0x4ac   : > { %2902 = vmatmul.mubr.msk.bf16.vlgmr.msra.gmra.mxu0 %vm750_vm2, %v1142_v40  ;;  %v1294_v45 = vmul.f32 %v3255_v42, %v4037_v21 }
 0x4ad   : > { %2912 = vmatpush3.bf16.msra.mxu0 %v3878_v4  ;;  %2913 = vmatprep.mubr.msk.bf16.mxu0 %vm3547_vm0, %v3546_v59 }
 0x4ae   : > { %2923 = vmatprep.subr.bf16.mxu0 %v3546_v59  ;;  %2960 = vmatpush3.bf16.msra.mxu1 %v3129_v34 }
 0x4af   : > { %v3257_v43 = vpop.eup %3256  ;;  %2961 = vmatprep.subr.bf16.mxu1 %v3130_v38 }
 0x4b0   : > { %v1295_v24 = vmul.f32 %v3257_v43, %v4042_v26  ;;  %v3133_v43 = vld [vmem:[%s3814_s4] sm:$0xff]  }
 0x4b1   : > { %v1537_v31 = vpop.xlane.xlu1 %1536 }
 0x4b2   : > { %v1296_v46 = vpack.c.bf16 %v1295_v24, %v1294_v45  ;;  %3262 = vrcp.f32 %v1537_v31  ;;  %2962 = vmatpush3.bf16.msra.mxu1 %v3130_v38  ;;  %v3312_v38 = vld [vmem:[#allocation2] sm:$0xff] }
 0x4b3   : > { %2963 = vmatprep.subr.bf16.mxu1 %v3131_v15 }
 0x4b4   : > { %2914 = vmatmul.mubr.msk.bf16.vlgmr.msra.gmra.mxu0 %vm750_vm2, %v1296_v46 }
 0x4b5   : > { %v1657_v49 = vpop.xlane.xlu1 %1656  ;;  %2925 = vmatprep.mubr.msk.bf16.mxu0 %vm3547_vm0, %v3546_v59 }
 0x4b6   : > { %2964 = vmatpush3.bf16.msra.mxu1 %v3131_v15 }
 0x4b7   : > { %v3259_v50 = vpop.eup %3258  ;;  %2965 = vmatprep.subr.bf16.mxu1 %v3132_v19 }
 0x4b8   : > { %v3261_v53 = vpop.eup %3260  ;;  %v1417_v35 = vmul.f32 %v3259_v50, %v4052_v57 }
 0x4b9   : > { %v1660_v4 = vpop.xlane.xlu1 %1659  ;;  %v1416_v55 = vmul.f32 %v3261_v53, %v4047_v51 }
 0x4ba   : > { %2966 = vmatpush3.bf16.msra.mxu1 %v3132_v19  ;;  %v3313_v19 = vld [vmem:[#allocation2 + $0x8] sm:$0xff] }
 0x4bb   : > { %v1418_v21 = vpack.c.bf16 %v1417_v35, %v1416_v55  ;;  %2967 = vmatprep.subr.bf16.mxu1 %v3133_v43 }
 0x4bd   : > { %v1421_v54 = vpop.permute.xlu1 %1420 }
 0x4be   : > { %2924 = vmatpush3.bf16.msra.mxu0 %v1421_v54  ;;  %2968 = vmatpush3.bf16.msra.mxu1 %v3133_v43 }
 0x4bf   : > { %2935 = vmatprep.subr.bf16.mxu0 %v3546_v59  ;;  %v3263_v57 = vpop.eup %3262 }
 0x4c0   : > { %v1541_v41 = vmul.f32 %v3263_v57, %v4056_v62 }
 0x4c1   : > { %2926 = vmatmul.mubr.msk.bf16.vlgmr.msra.gmra.mxu0 %vm750_vm2, %v1418_v21 }
 0x4c2   : > { %2937 = vmatprep.mubr.msk.bf16.mxu0 %vm3547_vm0, %v3546_v59 }
 0x4d2   : > { %v1534_v26 = vpop.xlane.xlu0 %1533 }
 0x4d3   : > { %3264 = vrcp.f32 %v1534_v26 }
 0x4d4   : > { %3266 = vrcp.f32 %v1660_v4 }
 0x4d5   : > { %3268 = vrcp.f32 %v1657_v49 }
 0x4d6   : > { %v1544_v58 = vpop.permute.xlu0 %1543 }
 0x4d7   : > { %2936 = vmatpush3.bf16.msra.mxu0 %v1544_v58 }
 0x4d8   : > { %2947 = vmatprep.subr.bf16.mxu0 %v3546_v59 }
 0x4da   : > { %v1667_v2 = vpop.permute.xlu0 %1666 }
 0x4e0   : > { %v3265_v51 = vpop.eup %3264 }
 0x4e1   : > { %v1540_v60 = vmul.f32 %v3265_v51, %v4079_v10  ;;  %v3267_v0 = vpop.eup %3266 }
 0x4e2   : > { %v3269_v3 = vpop.eup %3268  ;;  %v1664_v5 = vmul.f32 %v3267_v0, %v4071_v33 }
 0x4e3   : > { %v1542_v63 = vpack.c.bf16 %v1541_v41, %v1540_v60  ;;  %v1663_v44 = vmul.f32 %v3269_v3, %v4062_v47 }
 0x4e5   : > { %2938 = vmatmul.mubr.msk.bf16.vlgmr.msra.gmra.mxu0 %vm750_vm2, %v1542_v63  ;;  %v1665_v9 = vpack.c.bf16 %v1664_v5, %v1663_v44 }
 0x4e6   : > { %2948 = vmatpush3.bf16.msra.mxu0 %v1667_v2  ;;  %2949 = vmatprep.mubr.msk.bf16.mxu0 %vm3547_vm0, %v3546_v59 }
 0x4ec   : > { %v4125_v39 = vpop.f32.mrf.mxu0 }
 0x4ed   : > { %2950 = vmatmul.mubr.msk.bf16.vlgmr.msra.gmra.mxu0 %vm750_vm2, %v1665_v9 }
 0x4ee   : > { %v2867_v62 = vpop.f32.mrf.mxu0  ;;  %2116 = vmatprep.mubr.bf16.mxu0 %v3545_v25 }
 0x4f0   : > { %v4129_v8 = vpop.f32.mrf.mxu0 }
 0x4f2   : > { %v2868_v48 = vpop.f32.mrf.mxu0 }
 0x55c   : > { %v937_v10 = vpop.f32.mrf.mxu0 }
 0x55e   : > { %v2879_v52 = vpop.f32.mrf.mxu0 }
 0x560   : > { %v940_v12 = vpop.f32.mrf.mxu0 }
 0x561   : > { %v3064_v30 = vpack.i.bf16 %v940_v12, %v937_v10 }
 0x562   : > { %v2880_v59 = vpop.f32.mrf.mxu0 }
 0x563   : > { %3065 = vrot.lane.b32.xlu0 %v3064_v30, %s3550_s16 }
 0x564   : > { %v1060_v33 = vpop.f32.mrf.mxu0 }
 0x566   : > { %v2891_v47 = vpop.f32.mrf.mxu0 }
 0x568   : > { %v1063_v56 = vpop.f32.mrf.mxu0 }
 0x569   : > { %v3069_v13 = vpack.i.bf16 %v1063_v56, %v1060_v33 }
 0x56a   : > { %v2892_v61 = vpop.f32.mrf.mxu0 }
 0x56b   : > { %3070 = vrot.lane.b32.xlu1 %v3069_v13, %s3549_s9 }
 0x56c   : > { %v1183_v16 = vpop.f32.mrf.mxu0 }
 0x56e   : > { %v2903_v17 = vpop.f32.mrf.mxu0 }
 0x56f   : > { %v3134_v17 = vld [vmem:[%s3816_s29 + $0xe0] ss:$16 sps:$4 sm:$0xff]  }
 0x570   : > { %v1186_v18 = vpop.f32.mrf.mxu0 }
 0x571   : > { %v3074_v1 = vpack.i.bf16 %v1186_v18, %v1183_v16  ;;  %v3136_v18 = vld [vmem:[%s3816_s29 + $0xe4] ss:$16 sps:$4 sm:$0xff]  }
 0x572   : > { %v2904_v20 = vpop.f32.mrf.mxu0  ;;  %2084 = vmatprep.subr.bf16.mxu0 %v3136_v18 }
 0x573   : > { %3075 = vrot.lane.b32.xlu1 %v3074_v1, %s3548_s14  ;;  %v3137_v1 = vld [vmem:[%s3816_s29 + $0xe8] ss:$16 sps:$4 sm:$0xff]   ;;  %v3139_v20 = vld [vmem:[%s3816_s29 + $0xec] ss:$16 sps:$4 sm:$0xff]   ;;  %2085 = vmatpush1.bf16.msra.mxu0 %v3134_v17 }
 0x574   : > { %v4134_v22 = vpop.f32.mrf.mxu0  ;;  %2137 = vmatprep.subr.bf16.mxu1 %v3139_v20 }
 0x576   : > { %v2915_v23 = vpop.f32.mrf.mxu0 }
 0x577   : > { %v3145_v23 = vld [vmem:[%s3816_s29 + $0xcc] ss:$16 sps:$4 sm:$0xff]  }
 0x578   : > { %v4136_v6 = vpop.f32.mrf.mxu0 }
 0x57a   : > { %v2916_v27 = vpop.f32.mrf.mxu0 }
 0x57b   : > { %v3143_v27 = vld [vmem:[%s3816_s29 + $0xc8] ss:$16 sps:$4 sm:$0xff]  }
 0x581   : > { %v1460_v7 = vpop.f32.mrf.mxu0 }
 0x583   : > { %v2927_v14 = vpop.f32.mrf.mxu0 }
 0x585   : > { %v1463_v32 = vpop.f32.mrf.mxu0 }
 0x586   : > { %v3079_v36 = vpack.i.bf16 %v1463_v32, %v1460_v7  ;;  %v3310_v7 = vld [vmem:[#allocation2 + $0x10] sm:$0xff]  ;;  %v3311_v32 = vld [vmem:[#allocation2 + $0x18] sm:$0xff] }
 0x587   : > { %v2928_v37 = vpop.f32.mrf.mxu0 }
 0x588   : > { %3080 = vrot.lane.b32.xlu0 %v3079_v36, %s3550_s16 }
 0x5a5   : > { %v1583_v40 = vpop.f32.mrf.mxu0 }
 0x5a7   : > { %v2939_v42 = vpop.f32.mrf.mxu0 }
 0x5a9   : > { %v1586_v45 = vpop.f32.mrf.mxu0 }
 0x5aa   : > { %v3084_v24 = vpack.i.bf16 %v1586_v45, %v1583_v40 }
 0x5ab   : > { %v2940_v31 = vpop.f32.mrf.mxu0 }
 0x5ac   : > { %3085 = vrot.lane.b32.xlu0 %v3084_v24, %s3549_s9  ;;  %v3148_v24 = vld [vmem:[%s3816_s29 + $0xa4] ss:$16 sps:$4 sm:$0xff]   ;;  %v3151_v31 = vld [vmem:[%s3816_s29 + $0xac] ss:$16 sps:$4 sm:$0xff]  }
 0x5ad   : > { %v1706_v46 = vpop.f32.mrf.mxu0 }
 0x5af   : > { %v2951_v49 = vpop.f32.mrf.mxu0 }
 0x5b0   : > { %v3149_v49 = vld [vmem:[%s3816_s29 + $0xa8] ss:$16 sps:$4 sm:$0xff]  }
 0x5b1   : > { %v1709_v50 = vpop.f32.mrf.mxu0 }
 0x5b2   : > { %v3089_v4 = vpack.i.bf16 %v1709_v50, %v1706_v46  ;;  %v3146_v46 = vld [vmem:[%s3816_s29 + $0xa0] ss:$16 sps:$4 sm:$0xff]   ;;  %v3154_v50 = vld [vmem:[%s3816_s29 + $0x84] ss:$16 sps:$4 sm:$0xff]  }
 0x5b3   : > { %v2952_v53 = vpop.f32.mrf.mxu0 }
 0x5b4   : > { %3090 = vrot.lane.b32.xlu1 %v3089_v4, %s3548_s14  ;;  %v3157_v4 = vld [vmem:[%s3816_s29 + $0x8c] ss:$16 sps:$4 sm:$0xff]   ;;  %v3152_v53 = vld [vmem:[%s3816_s29 + $0x80] ss:$16 sps:$4 sm:$0xff]  }
 0x5d5   : > { %v3066_v35 = vpop.permute.xlu0 %3065 }
 0x5d6   : > { %v3068_v55 = vunpack.i.h.bf16 %v3066_v35  ;;  %v3067_v21 = vunpack.i.l.bf16 %v3066_v35  ;;  %v3155_v35 = vld [vmem:[%s3816_s29 + $0x88] ss:$16 sps:$4 sm:$0xff]  }
 0x5d8   : > { %v1215_v51 = vsel %vm700_vm1, %v4129_v8, %v3068_v55  ;;  %v1214_v60 = vsel %vm700_vm1, %v4125_v39, %v3067_v21  ;;  %v3163_v55 = vld [vmem:[%s3816_s29 + $0x6c] ss:$16 sps:$4 sm:$0xff]   ;;  %v3158_v21 = vld [vmem:[%s3816_s29 + $0x60] ss:$16 sps:$4 sm:$0xff]  }
 0x5dd   : > { %v3071_v54 = vpop.permute.xlu1 %3070 }
 0x5de   : > { %v3073_v26 = vunpack.i.h.bf16 %v3071_v54  ;;  %v3072_v58 = vunpack.i.l.bf16 %v3071_v54  ;;  %v3160_v54 = vld [vmem:[%s3816_s29 + $0x64] ss:$16 sps:$4 sm:$0xff]  }
 0x5e0   : > { %v1218_v0 = vsel %vm1216_vm3, %v1215_v51, %v3073_v26  ;;  %v1217_v2 = vsel %vm1216_vm3, %v1214_v60, %v3072_v58  ;;  %v3161_v26 = vld [vmem:[%s3816_s29 + $0x68] ss:$16 sps:$4 sm:$0xff]   ;;  %v3166_v58 = vld [vmem:[%s3816_s29 + $0x44] ss:$16 sps:$4 sm:$0xff]   ;;  %v3169_v60 = vld [vmem:[%s3816_s29 + $0x4c] ss:$16 sps:$4 sm:$0xff]  }
 0x5e1   : > { %v3167_v51 = vld [vmem:[%s3816_s29 + $0x48] ss:$16 sps:$4 sm:$0xff]  }
 0x5e5   : > { %v3076_v57 = vpop.permute.xlu1 %3075 }
 0x5e6   : > { %v3078_v41 = vunpack.i.h.bf16 %v3076_v57  ;;  %v3077_v63 = vunpack.i.l.bf16 %v3076_v57  ;;  %v3164_v57 = vld [vmem:[%s3816_s29 + $0x40] ss:$16 sps:$4 sm:$0xff]  }
 0x5e8   : > { %v1220_v3 = vsel %vm1219_vm4, %v1217_v2, %v3077_v63  ;;  %v1221_v5 = vsel %vm1219_vm4, %v1218_v0, %v3078_v41  ;;  %v3172_v41 = vld [vmem:[%s3816_s29 + $0x24] ss:$16 sps:$4 sm:$0xff]   ;;  %v3175_v63 = vld [vmem:[%s3816_s29 + $0x2c] ss:$16 sps:$4 sm:$0xff]   ;;  %v3170_v0 = vld [vmem:[%s3816_s29 + $0x20] ss:$16 sps:$4 sm:$0xff]  }
 0x5e9   : > { %v1743_v44 = vpack.c.bf16 %v1221_v5, %v1220_v3  ;;  %v3173_v2 = vld [vmem:[%s3816_s29 + $0x28] ss:$16 sps:$4 sm:$0xff]   ;;  %v3178_v3 = vld [vmem:[%s3816_s29 + $0x4] ss:$16 sps:$4 sm:$0xff]   ;;  %v3181_v5 = vld [vmem:[%s3816_s29 + $0xc] ss:$16 sps:$4 sm:$0xff]  }
 0x5eb   : > { %2969 = vmatprep.mubr.bf16.mxu1 %v1743_v44  ;;  %v3176_v44 = vld [vmem:[%s3816_s29] ss:$16 sps:$4 sm:$0xff]  }
 0x5fa   : > { %v3081_v9 = vpop.permute.xlu0 %3080 }
 0x5fb   : > { %v3083_v48 = vunpack.i.h.bf16 %v3081_v9  ;;  %v3082_v8 = vunpack.i.l.bf16 %v3081_v9  ;;  %v3179_v9 = vld [vmem:[%s3816_s29 + $0x8] ss:$16 sps:$4 sm:$0xff]  }
 0x5fd   : > { %v1738_v12 = vsel %vm700_vm1, %v4136_v6, %v3083_v48  ;;  %v1737_v30 = vsel %vm700_vm1, %v4134_v22, %v3082_v8  ;;  %v3142_v22 = vld [vmem:[%s3816_s29 + $0xc4] ss:$16 sps:$4 sm:$0xff]   ;;  %v3140_v6 = vld [vmem:[%s3816_s29 + $0xc0] ss:$16 sps:$4 sm:$0xff]  }
 0x5fe   : > { %2086 = vmatprep.subr.bf16.mxu0 %v3142_v22 }
 0x5ff   : > { %2087 = vmatpush1.bf16.msra.mxu0 %v3140_v6 }
 0x600   : > { %2088 = vmatprep.subr.bf16.mxu0 %v3148_v24  ;;  %v3196_v24 = vld [vmem:[%s3822_s11 + $0x40] sm:$0xff]  }
 0x603   : > { %2089 = vmatpush1.bf16.msra.mxu0 %v3146_v46 }
 0x604   : > { %2090 = vmatprep.subr.bf16.mxu0 %v3154_v50 }
 0x607   : > { %2091 = vmatpush1.bf16.msra.mxu0 %v3152_v53 }
 0x608   : > { %2092 = vmatprep.subr.bf16.mxu0 %v3160_v54 }
 0x60b   : > { %2093 = vmatpush1.bf16.msra.mxu0 %v3158_v21 }
 0x60c   : > { %2094 = vmatprep.subr.bf16.mxu0 %v3166_v58 }
 0x60f   : > { %2095 = vmatpush1.bf16.msra.mxu0 %v3164_v57 }
 0x610   : > { %2096 = vmatprep.subr.bf16.mxu0 %v3172_v41 }
 0x613   : > { %2097 = vmatpush1.bf16.msra.mxu0 %v3170_v0 }
 0x614   : > { %2098 = vmatprep.subr.bf16.mxu0 %v3178_v3 }
 0x617   : > { %2099 = vmatpush1.bf16.msra.mxu0 %v3176_v44 }
 0x61e   : > { %v3086_v62 = vpop.permute.xlu0 %3085 }
 0x61f   : > { %v3088_v10 = vunpack.i.h.bf16 %v3086_v62  ;;  %v3087_v39 = vunpack.i.l.bf16 %v3086_v62 }
 0x621   : > { %v1740_v47 = vsel %vm1216_vm3, %v1738_v12, %v3088_v10  ;;  %v1739_v56 = vsel %vm1216_vm3, %v1737_v30, %v3087_v39 }
 0x626   : > { %v3091_v52 = vpop.permute.xlu1 %3090 }
 0x627   : > { %v3093_v59 = vunpack.i.h.bf16 %v3091_v52  ;;  %v3092_v33 = vunpack.i.l.bf16 %v3091_v52 }
 0x629   : > { %v1742_v13 = vsel %vm1219_vm4, %v1740_v47, %v3093_v59  ;;  %v1741_v61 = vsel %vm1219_vm4, %v1739_v56, %v3092_v33 }
 0x62a   : > { %v1744_v16 = vpack.c.bf16 %v1742_v13, %v1741_v61 }
 0x62c   : > { %2970 = vmatmul.mubr.bf16.vlgmr.msra.gmra.mxu1 %v1744_v16 }
 0x62d   : > { %2169 = vmatprep.mubr.bf16.mxu1 %v3545_v25  ;;  %2138 = vmatpush1.bf16.msra.mxu1 %v3137_v1 }
 0x62e   : > { %2139 = vmatprep.subr.bf16.mxu1 %v3145_v23 }
 0x631   : > { %2140 = vmatpush1.bf16.msra.mxu1 %v3143_v27  ;;  %v3182_v27 = vld [vmem:[%s3822_s11 + $0x78] sm:$0xff]  }
 0x632   : > { %2141 = vmatprep.subr.bf16.mxu1 %v3151_v31  ;;  %2809 = vmatprep.subr.bf16.mxu0 %v3182_v27  ;;  %v3197_v31 = vld [vmem:[%s3822_s11] sm:$0xff]  }
 0x635   : > { %2142 = vmatpush1.bf16.msra.mxu1 %v3149_v49 }
 0x636   : > { %2143 = vmatprep.subr.bf16.mxu1 %v3157_v4 }
 0x639   : > { %2144 = vmatpush1.bf16.msra.mxu1 %v3155_v35 }
 0x63a   : > { %2145 = vmatprep.subr.bf16.mxu1 %v3163_v55 }
 0x63d   : > { %2146 = vmatpush1.bf16.msra.mxu1 %v3161_v26 }
 0x63e   : > { %2147 = vmatprep.subr.bf16.mxu1 %v3169_v60 }
 0x641   : > { %2148 = vmatpush1.bf16.msra.mxu1 %v3167_v51 }
 0x642   : > { %2149 = vmatprep.subr.bf16.mxu1 %v3175_v63 }
 0x645   : > { %2150 = vmatpush1.bf16.msra.mxu1 %v3173_v2 }
 0x646   : > { %2151 = vmatprep.subr.bf16.mxu1 %v3181_v5 }
 0x649   : > { %2152 = vmatpush1.bf16.msra.mxu1 %v3179_v9 }
 0x6ec   : > { %v2971_v28 = vpop.f32.mrf.mxu1 }
 0x6ed   : > { %v4176_v34 = vadd.f32 %v3311_v32, %v2971_v28  ;;  %v3183_v28 = vld [vmem:[%s3822_s11 + $0x38] sm:$0xff]   ;;  %v3188_v32 = vld [vmem:[%s3822_s11 + $0x60] sm:$0xff]  }
 0x6ee   : > { %v1843_v29 = vpop.f32.mrf.mxu1 }
 0x6ef   : > { %v4174_v11 = vadd.f32 %v3310_v7, %v1843_v29  ;;  %v1864_v42 = vmul.f32 %v4176_v34, %v4176_v34  ;;  %v3184_v29 = vld [vmem:[%s3822_s11 + $0x70] sm:$0xff]  }
 0x6f0   : > { %v2972_v14 = vpop.f32.mrf.mxu1  ;;  %v3185_v7 = vld [vmem:[%s3822_s11 + $0x30] sm:$0xff]  }
 0x6f1   : > { %v1862_v36 = vmul.f32 %v4174_v11, %v4174_v11  ;;  %v4182_v40 = vadd.f32 %v3313_v19, %v2972_v14  ;;  %v3187_v14 = vld [vmem:[%s3822_s11 + $0x28] sm:$0xff]   ;;  %v3192_v19 = vld [vmem:[%s3822_s11 + $0x50] sm:$0xff]  }
 0x6f2   : > { %v1846_v37 = vpop.f32.mrf.mxu1 }
 0x6f3   : > { %v4180_v15 = vadd.f32 %v3312_v38, %v1846_v37  ;;  %1866 = vadd.xlane.f32.xlu0 %v1862_v36  ;;  %v1865_v45 = vmul.f32 %v4182_v40, %v4182_v40  ;;  %v3189_v36 = vld [vmem:[%s3822_s11 + $0x20] sm:$0xff]   ;;  %v3190_v37 = vld [vmem:[%s3822_s11 + $0x58] sm:$0xff]  }
 0x6f4   : > { %v3191_v38 = vld [vmem:[%s3822_s11 + $0x18] sm:$0xff]  }
 0x6f5   : > { %v1863_v43 = vmul.f32 %v4180_v15, %v4180_v15 }
 0x6f7   : > { %1870 = vadd.xlane.f32.xlu0 %v1864_v42  ;;  %1868 = vadd.xlane.f32.xlu1 %v1863_v43  ;;  %v3193_v42 = vld [vmem:[%s3822_s11 + $0x10] sm:$0xff]   ;;  %v3194_v43 = vld [vmem:[%s3822_s11 + $0x48] sm:$0xff]  }
 0x6fb   : > { %1872 = vadd.xlane.f32.xlu0 %v1865_v45  ;;  %v3195_v45 = vld [vmem:[%s3822_s11 + $0x8] sm:$0xff]  }
 0x77c   : > { %v1867_v62 = vpop.xlane.xlu0 %1866 }
 0x77d   : > { %v1874_v48 = vmul.f32 0.0078125, %v1867_v62 }
 0x77f   : > { %v1878_v8 = vadd.f32 1e-06, %v1874_v48 }
 0x780   : > { %v1871_v10 = vpop.xlane.xlu0 %1870  ;;  %v1869_v39 = vpop.xlane.xlu1 %1868 }
 0x781   : > { %v1875_v52 = vmul.f32 0.0078125, %v1869_v39  ;;  %3270 = vrsqrt.f32 %v1878_v8  ;;  %v1876_v30 = vmul.f32 0.0078125, %v1871_v10 }
 0x783   : > { %v1879_v12 = vadd.f32 1e-06, %v1875_v52  ;;  %v1880_v56 = vadd.f32 1e-06, %v1876_v30 }
 0x784   : > { %v1873_v59 = vpop.xlane.xlu0 %1872 }
 0x785   : > { %v1877_v33 = vmul.f32 0.0078125, %v1873_v59  ;;  %3272 = vrsqrt.f32 %v1879_v12 }
 0x787   : > { %v1881_v47 = vadd.f32 1e-06, %v1877_v33 }
 0x789   : > { %3274 = vrsqrt.f32 %v1881_v47 }
 0x78a   : > { %3276 = vrsqrt.f32 %v1880_v56 }
 0x78e   : > { %v3271_v13 = vpop.eup %3270 }
 0x78f   : > { %v1886_v16 = vmul.f32 %v3271_v13, %v4174_v11 }
 0x792   : > { %v3273_v61 = vpop.eup %3272 }
 0x793   : > { %v1887_v17 = vmul.f32 %v3273_v61, %v4180_v15 }
 0x795   : > { %v1890_v18 = vpack.c.bf16 %v1887_v17, %v1886_v16 }
 0x796   : > { %v3275_v1 = vpop.eup %3274 }
 0x797   : > { %2117 = vmatmul.mubr.bf16.vlgmr.msra.gmra.mxu0 %v1890_v18  ;;  %2170 = vmatmul.mubr.bf16.vlgmr.msra.gmra.mxu1 %v1890_v18  ;;  %v3277_v20 = vpop.eup %3276  ;;  %v1889_v22 = vmul.f32 %v3275_v1, %v4182_v40 }
 0x798   : > { %2126 = vmatprep.mubr.bf16.mxu0 %v3545_v25  ;;  %2179 = vmatprep.mubr.bf16.mxu1 %v3545_v25  ;;  %v1888_v23 = vmul.f32 %v3277_v20, %v4176_v34  ;;  %v3186_v25 = vld [vmem:[%s3822_s11 + $0x68] sm:$0xff]  }
 0x799   : > { %2810 = vmatpush3.bf16.msra.mxu0 %v3183_v28 }
 0x79a   : > { %v1891_v6 = vpack.c.bf16 %v1889_v22, %v1888_v23  ;;  %2811 = vmatprep.subr.bf16.mxu0 %v3184_v29 }
 0x79d   : > { %2812 = vmatpush3.bf16.msra.mxu0 %v3185_v7 }
 0x79e   : > { %2813 = vmatprep.subr.bf16.mxu0 %v3186_v25 }
 0x79f   : > { %2127 = vmatmul.mubr.bf16.gmra.mxu0 %v1891_v6  ;;  %2180 = vmatmul.mubr.bf16.gmra.mxu1 %v1891_v6 }
 0x7a1   : > { %2814 = vmatpush3.bf16.msra.mxu0 %v3187_v14 }
 0x7a2   : > { %2815 = vmatprep.subr.bf16.mxu0 %v3188_v32 }
 0x7a5   : > { %2816 = vmatpush3.bf16.msra.mxu0 %v3189_v36 }
 0x7a6   : > { %2817 = vmatprep.subr.bf16.mxu0 %v3190_v37 }
 0x7a9   : > { %2818 = vmatpush3.bf16.msra.mxu0 %v3191_v38 }
 0x7aa   : > { %2819 = vmatprep.subr.bf16.mxu0 %v3192_v19 }
 0x7ad   : > { %2820 = vmatpush3.bf16.msra.mxu0 %v3193_v42 }
 0x7ae   : > { %2821 = vmatprep.subr.bf16.mxu0 %v3194_v43 }
 0x7b1   : > { %2822 = vmatpush3.bf16.msra.mxu0 %v3195_v45 }
 0x7b2   : > { %2823 = vmatprep.subr.bf16.mxu0 %v3196_v24 }
 0x7b5   : > { %2824 = vmatpush3.bf16.msra.mxu0 %v3197_v31 }
 0x857   : > { %v2118_v46 = vpop.f32.mrf.mxu0  ;;  %v2171_v9 = vpop.f32.mrf.mxu1 }
 0x858   : > { %v2724_v49 = vmul.f32 -1.442695, %v2118_v46 }
 0x859   : > { %v2120_v50 = vpop.f32.mrf.mxu0  ;;  %v2173_v39 = vpop.f32.mrf.mxu1 }
 0x85a   : > { %3278 = vpow2.f32 %v2724_v49  ;;  %v2725_v4 = vmul.f32 -1.442695, %v2120_v50 }
 0x85b   : > { %v2122_v53 = vpop.f32.mrf.mxu0  ;;  %v2175_v33 = vpop.f32.mrf.mxu1 }
 0x85c   : > { %3280 = vpow2.f32 %v2725_v4  ;;  %v2726_v35 = vmul.f32 -1.442695, %v2122_v53 }
 0x85d   : > { %v2124_v54 = vpop.f32.mrf.mxu0  ;;  %v2177_v61 = vpop.f32.mrf.mxu1 }
 0x85e   : > { %3282 = vpow2.f32 %v2726_v35  ;;  %v2727_v55 = vmul.f32 -1.442695, %v2124_v54 }
 0x85f   : > { %v4236_v21 = vpop.f32.mrf.mxu0  ;;  %v2181_v1 = vpop.f32.mrf.mxu1 }
 0x860   : > { %3284 = vpow2.f32 %v2727_v55  ;;  %v2728_v26 = vmul.f32 -1.442695, %v4236_v21 }
 0x861   : > { %v2130_v58 = vpop.f32.mrf.mxu0  ;;  %v2183_v29 = vpop.f32.mrf.mxu1 }
 0x862   : > { %3286 = vpow2.f32 %v2728_v26  ;;  %v2729_v57 = vmul.f32 -1.442695, %v2130_v58 }
 0x863   : > { %v2132_v51 = vpop.f32.mrf.mxu0  ;;  %v2185_v42 = vpop.f32.mrf.mxu1 }
 0x864   : > { %3288 = vpow2.f32 %v2729_v57  ;;  %v2730_v60 = vmul.f32 -1.442695, %v2132_v51 }
 0x865   : > { %v2134_v41 = vpop.f32.mrf.mxu0 }
 0x866   : > { %3290 = vpow2.f32 %v2730_v60  ;;  %v2731_v63 = vmul.f32 -1.442695, %v2134_v41 }
 0x867   : > { %v3279_v0 = vpop.eup %3278 }
 0x868   : > { %3292 = vpow2.f32 %v2731_v63  ;;  %v2214_v3 = vadd.f32 1.0, %v3279_v0 }
 0x869   : > { %v3281_v2 = vpop.eup %3280 }
 0x86a   : > { %v2215_v5 = vadd.f32 1.0, %v3281_v2 }
 0x86b   : > { %v3283_v44 = vpop.eup %3282 }
 0x86c   : > { %3294 = vrcp.f32 %v2215_v5  ;;  %v2216_v62 = vadd.f32 1.0, %v3283_v44 }
 0x86d   : > { %v3285_v48 = vpop.eup %3284  ;;  %3296 = vrcp.f32 %v2214_v3 }
 0x86e   : > { %3298 = vrcp.f32 %v2216_v62  ;;  %v2217_v8 = vadd.f32 1.0, %v3285_v48 }
 0x86f   : > { %v3287_v10 = vpop.eup %3286 }
 0x870   : > { %3300 = vrcp.f32 %v2217_v8  ;;  %v2218_v12 = vadd.f32 1.0, %v3287_v10 }
 0x871   : > { %v3289_v52 = vpop.eup %3288 }
 0x872   : > { %v2219_v30 = vadd.f32 1.0, %v3289_v52 }
 0x873   : > { %v3291_v59 = vpop.eup %3290 }
 0x874   : > { %3302 = vrcp.f32 %v2219_v30  ;;  %v2220_v47 = vadd.f32 1.0, %v3291_v59 }
 0x875   : > { %v3293_v56 = vpop.eup %3292  ;;  %3304 = vrcp.f32 %v2218_v12 }
 0x876   : > { %3306 = vrcp.f32 %v2220_v47  ;;  %v2221_v13 = vadd.f32 1.0, %v3293_v56 }
 0x878   : > { %3308 = vrcp.f32 %v2221_v13 }
 0x879   : > { %v3295_v16 = vpop.eup %3294 }
 0x87a   : > { %v3297_v17 = vpop.eup %3296  ;;  %v2239_v20 = vmul.f32 %v3295_v16, %v2120_v50  ;;  %v2187_v50 = vpop.f32.mrf.mxu1 }
 0x87b   : > { %v3299_v18 = vpop.eup %3298  ;;  %v2238_v6 = vmul.f32 %v3297_v17, %v2118_v46 }
 0x87c   : > { %v2240_v22 = vmul.f32 %v3299_v18, %v2122_v53  ;;  %v2247_v7 = vmul.f32 %v2239_v20, %v2173_v39 }
 0x87d   : > { %v3301_v23 = vpop.eup %3300  ;;  %v2246_v32 = vmul.f32 %v2238_v6, %v2171_v9 }
 0x87e   : > { %v2241_v27 = vmul.f32 %v3301_v23, %v2124_v54  ;;  %v2248_v28 = vmul.f32 %v2240_v22, %v2175_v33 }
 0x880   : > { %v2249_v25 = vmul.f32 %v2241_v27, %v2177_v61  ;;  %v2254_v19 = vpack.c.bf16 %v2248_v28, %v2246_v32 }
 0x881   : > { %v3303_v14 = vpop.eup %3302 }
 0x882   : > { %v3305_v36 = vpop.eup %3304  ;;  %v2255_v37 = vpack.c.bf16 %v2249_v25, %v2247_v7  ;;  %v2243_v43 = vmul.f32 %v3303_v14, %v2130_v58 }
 0x883   : > { %v3307_v38 = vpop.eup %3306  ;;  %v2242_v31 = vmul.f32 %v3305_v36, %v4236_v21 }
 0x884   : > { %v2244_v45 = vmul.f32 %v3307_v38, %v2132_v51  ;;  %2418 = vmatprep.mubr.bf16.mxu0 %v2255_v37  ;;  %v2251_v4 = vmul.f32 %v2243_v43, %v2183_v29 }
 0x885   : > { %v3309_v24 = vpop.eup %3308  ;;  %2419 = vmatmul.mubr.bf16.vlgmr.msra.gmra.mxu0 %v2254_v19  ;;  %v2250_v35 = vmul.f32 %v2242_v31, %v2181_v1 }
 0x886   : > { %v2245_v46 = vmul.f32 %v3309_v24, %v2134_v41  ;;  %v2252_v49 = vmul.f32 %v2244_v45, %v2185_v42 }
 0x888   : > { %v2253_v53 = vmul.f32 %v2245_v46, %v2187_v50  ;;  %v2256_v55 = vpack.c.bf16 %v2252_v49, %v2250_v35 }
 0x88a   : > { %v2257_v54 = vpack.c.bf16 %v2253_v53, %v2251_v4 }
 0x88c   : > { %2426 = vmatprep.mubr.bf16.mxu0 %v2257_v54 }
 0x88d   : > { %2427 = vmatmul.mubr.bf16.gmra.mxu0 %v2256_v55 }
 0x945   : > { %v2825_v26 = vpop.f32.mrf.mxu0 }
 0x947   : > { %v2826_v57 = vpop.f32.mrf.mxu0 }
 0x948   : > { %v2827_v60 = vadd.f32 %v2826_v57, %v2825_v26 }
 0x949   : > { %v2828_v58 = vpop.f32.mrf.mxu0 }
 0x94a   : > { %v2435_v51 = vadd.f32 %v2827_v60, %v4174_v11 }
 0x94b   : > { %v2829_v63 = vpop.f32.mrf.mxu0 }
 0x94c   : > { %2439 = vst [vmem:[#allocation2 + $0x10] sm:$0xff] %v2435_v51  ;;  %v2830_v21 = vadd.f32 %v2829_v63, %v2828_v58 }
 0x94d   : > { %v2831_v0 = vpop.f32.mrf.mxu0 }
 0x94e   : > { %v2436_v41 = vadd.f32 %v2830_v21, %v4180_v15 }
 0x94f   : > { %v2832_v2 = vpop.f32.mrf.mxu0 }
 0x950   : > { %2440 = vst [vmem:[#allocation2] sm:$0xff] %v2436_v41  ;;  %v2833_v3 = vadd.f32 %v2832_v2, %v2831_v0 }
 0x951   : > { %v2834_v5 = vpop.f32.mrf.mxu0 }
 0x952   : > { %v2437_v44 = vadd.f32 %v2833_v3, %v4176_v34 }
 0x953   : > { %v2835_v9 = vpop.f32.mrf.mxu0 }
 0x954   : > { %2441 = vst [vmem:[#allocation2 + $0x18] sm:$0xff] %v2437_v44  ;;  %v2836_v62 = vadd.f32 %v2835_v9, %v2834_v5  ;;  %2446 = sbr.rel (%p2748_p11) target bundleno = 2561 (0xa01), region = 72 }
 0x956   : > { %v2438_v48 = vadd.f32 %v2836_v62, %v4182_v40 }
 0x958   : > { %2442 = vst [vmem:[#allocation2 + $0x8] sm:$0xff] %v2438_v48 }
 0x959   : > { %v2449_v11 = vmul.f32 %v2437_v44, %v2437_v44  ;;  %v2447_v8 = vmul.f32 %v2435_v51, %v2435_v51  ;;  %v2450_v15 = vmul.f32 %v2438_v48, %v2438_v48  ;;  %v2448_v10 = vmul.f32 %v2436_v41, %v2436_v41  ;;  %v2749_v17 = vld [vmem:[%s4274_s1] ss:$0 sm:$0xff] }
 0x95b   : > { %2455 = vadd.xlane.f32.xlu1 %v2449_v11  ;;  %2451 = vadd.xlane.f32.xlu0 %v2447_v8 }
 0x95f   : > { %2457 = vadd.xlane.f32.xlu1 %v2450_v15  ;;  %2453 = vadd.xlane.f32.xlu0 %v2448_v10 }
 0x9e4   : > { %v2456_v39 = vpop.xlane.xlu1 %2455  ;;  %v2452_v52 = vpop.xlane.xlu0 %2451 }
 0x9e5   : > { %v2461_v34 = vmul.f32 0.0078125, %v2456_v39  ;;  %v2459_v12 = vmul.f32 0.0078125, %v2452_v52 }
 0x9e7   : > { %v2465_v30 = vadd.f32 1e-06, %v2461_v34  ;;  %v2463_v59 = vadd.f32 1e-06, %v2459_v12 }
 0x9e8   : > { %v2458_v33 = vpop.xlane.xlu1 %2457  ;;  %v2454_v40 = vpop.xlane.xlu0 %2453 }
 0x9e9   : > { %3314 = vrsqrt.f32 %v2465_v30  ;;  %v2462_v47 = vmul.f32 0.0078125, %v2458_v33  ;;  %v2460_v56 = vmul.f32 0.0078125, %v2454_v40 }
 0x9ea   : > { %3316 = vrsqrt.f32 %v2463_v59 }
 0x9eb   : > { %v2466_v13 = vadd.f32 1e-06, %v2462_v47  ;;  %v2464_v61 = vadd.f32 1e-06, %v2460_v56 }
 0x9ed   : > { %3318 = vrsqrt.f32 %v2466_v13 }
 0x9ee   : > { %3320 = vrsqrt.f32 %v2464_v61 }
 0x9f6   : > { %v3315_v16 = vpop.eup %3314 }
 0x9f7   : > { %v3317_v18 = vpop.eup %3316  ;;  %v2473_v1 = vmul.f32 %v3315_v16, %v2437_v44 }
 0x9f8   : > { %v2471_v20 = vmul.f32 %v3317_v18, %v2435_v51 }
 0x9f9   : > { %v2484_v22 = vmul.f32 %v2749_v17, %v2473_v1 }
 0x9fa   : > { %v3319_v23 = vpop.eup %3318  ;;  %v2482_v6 = vmul.f32 %v2749_v17, %v2471_v20 }
 0x9fb   : > { %v3321_v27 = vpop.eup %3320  ;;  %2488 = vst [vmem:[#allocation12 + $0x10] sm:$0xff] %v2484_v22  ;;  %v2474_v28 = vmul.f32 %v3319_v23, %v2438_v48 }
 0x9fc   : > { %2486 = vst [vmem:[#allocation12] sm:$0xff] %v2482_v6  ;;  %v2472_v29 = vmul.f32 %v3321_v27, %v2436_v41 }
 0x9fd   : > { %v2485_v7 = vmul.f32 %v2749_v17, %v2474_v28 }
 0x9fe   : > { %v2483_v25 = vmul.f32 %v2749_v17, %v2472_v29 }
 0x9ff   : > { %2489 = vst [vmem:[#allocation12 + $0x18] sm:$0xff] %v2485_v7 }
 0xa00   : > { %2487 = vst [vmem:[#allocation12 + $0x8] sm:$0xff] %v2483_v25 }
 0xa01 PF: > { %p3012_p13 = scmp.eq.s32.totalorder %s3705_s12, 1  ;;  %s3551_s18 = smov [#allocation12]  }
 0xa02   : > { %s2496_s7 = sshll.u32 %s3551_s18, 4  ;;  %s2497_s7 = int_to_ptr.vmem [resolvable:$true] %s2496_s7 }
 0xa03   : > { %s3460_s30 = scalar_lea.vmem %s2497_s7, 512  ;;  %p3467_p8 = scmp.lt.s32.totalorder %s2497_s7, %s2497_s7 }
 0xa04   : > { %p3461_p0 = scmp.ne.s32.totalorder %s2497_s7, %s3460_s30  ;;  %p3468_p2 = scmp.lt.s32.totalorder %s3460_s30, %s3460_s30 }
 0xa06   : > { %p3462_p6 = pnand %p3461_p0, %p3012_p13  ;;  %p3469_p12 = por %p3468_p2, %p3467_p8 }
 0xa08   : > { %p3463_p4 = pneg %p3462_p6 }
 0xa0a   : > { %p3470_p1 = pnand %p3469_p12, %p3463_p4 }
 0xa0c   : > { %3473 = shalt.err (!%p3470_p1)
}
 0xa0d   : > { %s3552_s20 = smov 128   ;;  %s3553_s2 = smov 8  }
 0xa0e   : > { %2989 = dma.vmem_to_hbm [thread:$0]  (%p3012_p13), %s2497_s7, 512, %s4279_s6, [#allocation5], %s3552_s20, %s3552_s20, %s3553_s2  }
 0xa0f   : > { %3513 = dma.done.wait (%p3012_p13), [#allocation5], 512  }
 0xa10   : > { %3515 = vsyncadd (%p3012_p13), [#allocation5], 4294966784 }
 0xa11 PF: > { %s4300_s8 = sld [smem:[#allocation17_spill]]  ;;  %p21_p7 = scmp.ge.s32.totalorder %s3610_s25, 4  }
 0xa12   : > { %s4301_s23 = sld [smem:[#allocation18_spill]]  ;;  %s4302_s21 = smov %s3522_s22 }
 0xa13   : > { %s4304_s24 = smov %s3610_s25  ;;  %23 = sbr.rel (!%p21_p7) target bundleno = 10 (0xa), region = 129 }
 0xa17   : > { %s4303_s22 = smov %s4300_s8 }
 0xa18   :  { %2512 = vsyncpa [#allocation4], 1 }
 0xa19   :  { %2514 = vsyncpa [#allocation4 + $0x1], 1 }
 0xa1a   :  { %2515 = vsyncpa [#allocation7], 1 }
 0xa1b   :  { %2517 = vsyncpa [#allocation7 + $0x1], 1 }
 0xa1c   :  { %2518 = vsyncpa [#allocation10], 1 }
 0xa1d   :  { %2520 = vsyncpa [#allocation10 + $0x1], 1 }
 0xa1e   :  { %2521 = vsyncpa [#allocation5], 1 }
 0xa1f   :  { %2523 = vsyncpa [#allocation5 + $0x1], 1 }

</bundles_post_ra>
